<compile_context>
chip_gen: v7x
topology: tpu7x:2x2x1
jax: 0.10.0
libtpu: 0.0.40
codegen_flags: <defaults>
</compile_context>

<pallas_src>
import jax
import jax.numpy as jnp
from jax.experimental import pallas as pl
from jax.experimental.pallas import tpu as pltpu


def _round_up(x, m):
    return ((x + m - 1) // m) * m


def _critic_kernel(s_ref, a_ref,
                   w1s_ref, w1a_ref, b1_ref,
                   w2_ref, b2_ref, w5_ref, b5_ref,
                   w3_ref, w6_ref, b36_ref,
                   q_ref):
    s = s_ref[...].astype(jnp.bfloat16)
    a = a_ref[...].astype(jnp.bfloat16)

    # ----- fused layer 1 (both branches): [h|g] = [s|a] @ [W1|W4] + [b1|b4] ---
    # realised as two row-split dots so we never build sa = concat(s, a).
    hg = (jnp.dot(s, w1s_ref[...], preferred_element_type=jnp.float32)
          + jnp.dot(a, w1a_ref[...], preferred_element_type=jnp.float32)
          + b1_ref[...])
    hg = jnp.maximum(hg, 0.0)

    h1p = w2_ref.shape[0]                      # padded hidden width (mult of 128)
    h = hg[:, :h1p].astype(jnp.bfloat16)       # Q1 branch activations
    g = hg[:, h1p:].astype(jnp.bfloat16)       # Q2 branch activations

    # ----- layer 2 per branch ------------------------------------------------
    h2 = jnp.maximum(
        jnp.dot(h, w2_ref[...], preferred_element_type=jnp.float32) + b2_ref[...],
        0.0).astype(jnp.bfloat16)
    g2 = jnp.maximum(
        jnp.dot(g, w5_ref[...], preferred_element_type=jnp.float32) + b5_ref[...],
        0.0).astype(jnp.bfloat16)

    # ----- fused heads: q[:,0] = h2 @ w3, q[:,1] = g2 @ w6 -------------------
    q = (jnp.dot(h2, w3_ref[...], preferred_element_type=jnp.float32)
         + jnp.dot(g2, w6_ref[...], preferred_element_type=jnp.float32)
         + b36_ref[...])
    q_ref[...] = q.astype(q_ref.dtype)


@jax.jit
def critic_forward(state, action, packed):
    """Pallas equivalent of Critic.forward(state, action) -> (q1, q2)."""
    B, sd = state.shape
    ad = action.shape[1]

    # Batch padding / tiling: tile only when the batch is large enough to pay.
    if B >= 512:
        tb = 256
        bp = _round_up(B, tb)
    else:
        bp = _round_up(B, 8)
        tb = bp
    grid = (bp // tb,)

    if bp != B:
        state_p = jnp.pad(state, ((0, bp - B), (0, 0)))
        action_p = jnp.pad(action, ((0, bp - B), (0, 0)))
    else:
        state_p, action_p = state, action

    def _resident(arr):
        # Whole-array block, constant index map -> stays in VMEM across steps.
        return pl.BlockSpec(arr.shape, lambda i: (0, 0))

    weight_order = ("w1s", "w1a", "b1", "w2", "b2", "w5", "b5", "w3", "w6", "b36")
    weight_args = [packed[k] for k in weight_order]

    in_specs = [
        pl.BlockSpec((tb, sd), lambda i: (i, 0)),
        pl.BlockSpec((tb, ad), lambda i: (i, 0)),
    ] + [_resident(w) for w in weight_args]

    q = pl.pallas_call(
        _critic_kernel,
        out_shape=jax.ShapeDtypeStruct((bp, 2), jnp.float32),
        grid=grid,
        in_specs=in_specs,
        out_specs=pl.BlockSpec((tb, 2), lambda i: (i, 0)),
        compiler_params=pltpu.CompilerParams(
            dimension_semantics=("parallel",)),
    )(state_p, action_p, *weight_args)

    q1 = q[:B, 0:1]
    q2 = q[:B, 1:2]
    return q1, q2


def init_critic_params(key, state_dim, action_dim, neurons=(400, 300)):
    """Deterministic init matching nn.Linear default: U(-1/sqrt(fan_in), +...).

    Weights are stored transposed vs. PyTorch, i.e. (in, out); biases as (1, out).
    """
    dims = [
        (state_dim + action_dim, neurons[0]),  # l1
        (neurons[0], neurons[1]),              # l2
        (neurons[1], 1),                       # l3
        (state_dim + action_dim, neurons[0]),  # l4
        (neurons[0], neurons[1]),              # l5
        (neurons[1], 1),                       # l6
    ]
    params = {}
    for idx, (fan_in, fan_out) in enumerate(dims, start=1):
        key, kw, kb = jax.random.split(key, 3)
        bound = 1.0 / jnp.sqrt(fan_in)
        params[f"w{idx}"] = jax.random.uniform(
            kw, (fan_in, fan_out), jnp.float32, -bound, bound)
        params[f"b{idx}"] = jax.random.uniform(
            kb, (1, fan_out), jnp.float32, -bound, bound)
    return params


def pack_critic_params(params, state_dim):
    """One-time repack: fuse branches, zero-pad hidden dims to 128, cast bf16."""
    h1 = params["w1"].shape[1]
    h2 = params["w2"].shape[1]
    h1p = _round_up(h1, 128)
    h2p = _round_up(h2, 128)

    def pad_to(x, shape):
        return jnp.zeros(shape, x.dtype).at[:x.shape[0], :x.shape[1]].set(x)

    # Fused layer-1 weight (D, 2*h1p): columns [0:h1p) -> Q1 branch, rest -> Q2.
    w14 = jnp.concatenate(
        [pad_to(params["w1"], (params["w1"].shape[0], h1p)),
         pad_to(params["w4"], (params["w4"].shape[0], h1p))], axis=1)
    b14 = jnp.concatenate(
        [pad_to(params["b1"], (1, h1p)), pad_to(params["b4"], (1, h1p))], axis=1)

    # Fused heads: W3 in lane 0, W6 in lane 1 of (h2p, 2) weights.
    w3p = jnp.zeros((h2p, 2), jnp.float32).at[:h2, 0:1].set(params["w3"])
    w6p = jnp.zeros((h2p, 2), jnp.float32).at[:h2, 1:2].set(params["w6"])
    b36 = jnp.concatenate([params["b3"], params["b6"]], axis=1)

    return {
        "w1s": w14[:state_dim].astype(jnp.bfloat16),   # (sd, 2*h1p)
        "w1a": w14[state_dim:].astype(jnp.bfloat16),   # (ad, 2*h1p)
        "b1": b14.astype(jnp.float32),                 # (1, 2*h1p)
        "w2": pad_to(params["w2"], (h1p, h2p)).astype(jnp.bfloat16),
        "b2": pad_to(params["b2"], (1, h2p)).astype(jnp.float32),
        "w5": pad_to(params["w5"], (h1p, h2p)).astype(jnp.bfloat16),
        "b5": pad_to(params["b5"], (1, h2p)).astype(jnp.float32),
        "w3": w3p.astype(jnp.bfloat16),                # (h2p, 2)
        "w6": w6p.astype(jnp.bfloat16),                # (h2p, 2)
        "b36": b36.astype(jnp.float32),                # (1, 2)
    }


def critic_reference(state, action, params):
    """Pure-JAX f32 reference matching the PyTorch module exactly."""
    sa = jnp.concatenate([state, action], axis=1)
    h = jax.nn.relu(sa @ params["w1"] + params["b1"])
    h = jax.nn.relu(h @ params["w2"] + params["b2"])
    q1 = h @ params["w3"] + params["b3"]
    g = jax.nn.relu(sa @ params["w4"] + params["b4"])
    g = jax.nn.relu(g @ params["w5"] + params["b5"])
    q2 = g @ params["w6"] + params["b6"]
    return q1, q2


if __name__ == "__main__":
    # Small but representative shapes; module-default hidden widths (400, 300)
    # get padded to (512, 384) inside pack_critic_params.
    batch, state_dim, action_dim = 8, 12, 4
    neurons = (400, 300)

    key = jax.random.PRNGKey(0)
    key, ks, ka, kp = jax.random.split(key, 4)
    state = jax.random.normal(ks, (batch, state_dim), jnp.float32)
    action = jax.random.normal(ka, (batch, action_dim), jnp.float32)
    params = init_critic_params(kp, state_dim, action_dim, neurons)
    packed = pack_critic_params(params, state_dim)

    q1, q2 = critic_forward(state, action, packed)
    jax.block_until_ready((q1, q2))

    r1, r2 = critic_reference(state, action, params)
    assert q1.shape == (batch, 1) and q2.shape == (batch, 1)
    # bf16 matmul operands (f32 accumulation) -> looser tolerance than pure f32.
    assert jnp.allclose(q1, r1, atol=3e-2, rtol=3e-2), (q1, r1)
    assert jnp.allclose(q2, r2, atol=3e-2, rtol=3e-2), (q2, r2)

    print("KERNEL_OK")
</pallas_src>

<mosaic_0001>
module attributes {stable_mosaic.version = 11 : i64} {
  func.func @_critic_kernel(%arg0: i32, %arg1: memref<8x12xf32, #tpu.memory_space<vmem>>, %arg2: memref<8x4xf32, #tpu.memory_space<vmem>>, %arg3: memref<12x1024xbf16, #tpu.memory_space<vmem>>, %arg4: memref<4x1024xbf16, #tpu.memory_space<vmem>>, %arg5: memref<1x1024xf32, #tpu.memory_space<vmem>>, %arg6: memref<512x384xbf16, #tpu.memory_space<vmem>>, %arg7: memref<1x384xf32, #tpu.memory_space<vmem>>, %arg8: memref<512x384xbf16, #tpu.memory_space<vmem>>, %arg9: memref<1x384xf32, #tpu.memory_space<vmem>>, %arg10: memref<384x2xbf16, #tpu.memory_space<vmem>>, %arg11: memref<384x2xbf16, #tpu.memory_space<vmem>>, %arg12: memref<1x2xf32, #tpu.memory_space<vmem>>, %arg13: memref<8x2xf32, #tpu.memory_space<vmem>>) attributes {dimension_semantics = [#tpu.dimension_semantics<parallel>], iteration_bounds = array<i64: 1>, scalar_prefetch = 0 : i64, scratch_operands = 0 : i64, tpu.core_type = #tpu.core_type<tc>, window_params = [{transform_indices = @transform_0, window_bounds = array<i64: 8, 12>}, {transform_indices = @transform_1, window_bounds = array<i64: 8, 4>}, {pipeline_mode = #tpu.pipeline_mode<synchronous>, transform_indices = @transform_2, window_bounds = array<i64: 12, 1024>}, {pipeline_mode = #tpu.pipeline_mode<synchronous>, transform_indices = @transform_3, window_bounds = array<i64: 4, 1024>}, {pipeline_mode = #tpu.pipeline_mode<synchronous>, transform_indices = @transform_4, window_bounds = array<i64: 1, 1024>}, {pipeline_mode = #tpu.pipeline_mode<synchronous>, transform_indices = @transform_5, window_bounds = array<i64: 512, 384>}, {pipeline_mode = #tpu.pipeline_mode<synchronous>, transform_indices = @transform_6, window_bounds = array<i64: 1, 384>}, {pipeline_mode = #tpu.pipeline_mode<synchronous>, transform_indices = @transform_7, window_bounds = array<i64: 512, 384>}, {pipeline_mode = #tpu.pipeline_mode<synchronous>, transform_indices = @transform_8, window_bounds = array<i64: 1, 384>}, {pipeline_mode = #tpu.pipeline_mode<synchronous>, transform_indices = @transform_9, window_bounds = array<i64: 384, 2>}, {pipeline_mode = #tpu.pipeline_mode<synchronous>, transform_indices = @transform_10, window_bounds = array<i64: 384, 2>}, {pipeline_mode = #tpu.pipeline_mode<synchronous>, transform_indices = @transform_11, window_bounds = array<i64: 1, 2>}, {transform_indices = @transform_12, window_bounds = array<i64: 8, 2>}]} {
    %c0 = arith.constant 0 : index
    %c0_0 = arith.constant 0 : index
    %0 = vector.load %arg1[%c0, %c0_0] : memref<8x12xf32, #tpu.memory_space<vmem>>, vector<8x12xf32>
    %1 = arith.truncf %0 : vector<8x12xf32> to vector<8x12xbf16>
    %c0_1 = arith.constant 0 : index
    %c0_2 = arith.constant 0 : index
    %2 = vector.load %arg2[%c0_1, %c0_2] : memref<8x4xf32, #tpu.memory_space<vmem>>, vector<8x4xf32>
    %3 = arith.truncf %2 : vector<8x4xf32> to vector<8x4xbf16>
    %c0_3 = arith.constant 0 : index
    %c0_4 = arith.constant 0 : index
    %4 = vector.load %arg3[%c0_3, %c0_4] : memref<12x1024xbf16, #tpu.memory_space<vmem>>, vector<12x1024xbf16>
    %cst = arith.constant dense<0.000000e+00> : vector<8x1024xf32>
    %5 = tpu.matmul %1, %4, %cst {dimension_numbers = #tpu.dot_dimension_numbers<[1], [0], [0], [1], [0, 0, 1, 1], [], []>} : vector<8x12xbf16>, vector<12x1024xbf16>, vector<8x1024xf32> -> vector<8x1024xf32>
    %c0_5 = arith.constant 0 : index
    %c0_6 = arith.constant 0 : index
    %6 = vector.load %arg4[%c0_5, %c0_6] : memref<4x1024xbf16, #tpu.memory_space<vmem>>, vector<4x1024xbf16>
    %cst_7 = arith.constant dense<0.000000e+00> : vector<8x1024xf32>
    %7 = tpu.matmul %3, %6, %cst_7 {dimension_numbers = #tpu.dot_dimension_numbers<[1], [0], [0], [1], [0, 0, 1, 1], [], []>} : vector<8x4xbf16>, vector<4x1024xbf16>, vector<8x1024xf32> -> vector<8x1024xf32>
    %8 = arith.addf %5, %7 : vector<8x1024xf32>
    %c0_8 = arith.constant 0 : index
    %c0_9 = arith.constant 0 : index
    %9 = vector.load %arg5[%c0_8, %c0_9] : memref<1x1024xf32, #tpu.memory_space<vmem>>, vector<1x1024xf32>
    %10 = vector.broadcast %9 : vector<1x1024xf32> to vector<8x1024xf32>
    %11 = arith.addf %8, %10 : vector<8x1024xf32>
    %cst_10 = arith.constant 0.000000e+00 : f32
    %12 = vector.broadcast %cst_10 : f32 to vector<8x1024xf32>
    %13 = arith.maximumf %11, %12 : vector<8x1024xf32>
    %14 = vector.extract_strided_slice %13 {offsets = [0, 0], sizes = [8, 512], strides = [1, 1]} : vector<8x1024xf32> to vector<8x512xf32>
    %15 = arith.truncf %14 : vector<8x512xf32> to vector<8x512xbf16>
    %16 = vector.extract_strided_slice %13 {offsets = [0, 512], sizes = [8, 512], strides = [1, 1]} : vector<8x1024xf32> to vector<8x512xf32>
    %17 = arith.truncf %16 : vector<8x512xf32> to vector<8x512xbf16>
    %c0_11 = arith.constant 0 : index
    %c0_12 = arith.constant 0 : index
    %18 = vector.load %arg6[%c0_11, %c0_12] : memref<512x384xbf16, #tpu.memory_space<vmem>>, vector<512x384xbf16>
    %cst_13 = arith.constant dense<0.000000e+00> : vector<8x384xf32>
    %19 = tpu.matmul %15, %18, %cst_13 {dimension_numbers = #tpu.dot_dimension_numbers<[1], [0], [0], [1], [0, 0, 1, 1], [], []>} : vector<8x512xbf16>, vector<512x384xbf16>, vector<8x384xf32> -> vector<8x384xf32>
    %c0_14 = arith.constant 0 : index
    %c0_15 = arith.constant 0 : index
    %20 = vector.load %arg7[%c0_14, %c0_15] : memref<1x384xf32, #tpu.memory_space<vmem>>, vector<1x384xf32>
    %21 = vector.broadcast %20 : vector<1x384xf32> to vector<8x384xf32>
    %22 = arith.addf %19, %21 : vector<8x384xf32>
    %cst_16 = arith.constant 0.000000e+00 : f32
    %23 = vector.broadcast %cst_16 : f32 to vector<8x384xf32>
    %24 = arith.maximumf %22, %23 : vector<8x384xf32>
    %25 = arith.truncf %24 : vector<8x384xf32> to vector<8x384xbf16>
    %c0_17 = arith.constant 0 : index
    %c0_18 = arith.constant 0 : index
    %26 = vector.load %arg8[%c0_17, %c0_18] : memref<512x384xbf16, #tpu.memory_space<vmem>>, vector<512x384xbf16>
    %cst_19 = arith.constant dense<0.000000e+00> : vector<8x384xf32>
    %27 = tpu.matmul %17, %26, %cst_19 {dimension_numbers = #tpu.dot_dimension_numbers<[1], [0], [0], [1], [0, 0, 1, 1], [], []>} : vector<8x512xbf16>, vector<512x384xbf16>, vector<8x384xf32> -> vector<8x384xf32>
    %c0_20 = arith.constant 0 : index
    %c0_21 = arith.constant 0 : index
    %28 = vector.load %arg9[%c0_20, %c0_21] : memref<1x384xf32, #tpu.memory_space<vmem>>, vector<1x384xf32>
    %29 = vector.broadcast %28 : vector<1x384xf32> to vector<8x384xf32>
    %30 = arith.addf %27, %29 : vector<8x384xf32>
    %cst_22 = arith.constant 0.000000e+00 : f32
    %31 = vector.broadcast %cst_22 : f32 to vector<8x384xf32>
    %32 = arith.maximumf %30, %31 : vector<8x384xf32>
    %33 = arith.truncf %32 : vector<8x384xf32> to vector<8x384xbf16>
    %c0_23 = arith.constant 0 : index
    %c0_24 = arith.constant 0 : index
    %34 = vector.load %arg10[%c0_23, %c0_24] : memref<384x2xbf16, #tpu.memory_space<vmem>>, vector<384x2xbf16>
    %cst_25 = arith.constant dense<0.000000e+00> : vector<8x2xf32>
    %35 = tpu.matmul %25, %34, %cst_25 {dimension_numbers = #tpu.dot_dimension_numbers<[1], [0], [0], [1], [0, 0, 1, 1], [], []>} : vector<8x384xbf16>, vector<384x2xbf16>, vector<8x2xf32> -> vector<8x2xf32>
    %c0_26 = arith.constant 0 : index
    %c0_27 = arith.constant 0 : index
    %36 = vector.load %arg11[%c0_26, %c0_27] : memref<384x2xbf16, #tpu.memory_space<vmem>>, vector<384x2xbf16>
    %cst_28 = arith.constant dense<0.000000e+00> : vector<8x2xf32>
    %37 = tpu.matmul %33, %36, %cst_28 {dimension_numbers = #tpu.dot_dimension_numbers<[1], [0], [0], [1], [0, 0, 1, 1], [], []>} : vector<8x384xbf16>, vector<384x2xbf16>, vector<8x2xf32> -> vector<8x2xf32>
    %38 = arith.addf %35, %37 : vector<8x2xf32>
    %c0_29 = arith.constant 0 : index
    %c0_30 = arith.constant 0 : index
    %39 = vector.load %arg12[%c0_29, %c0_30] : memref<1x2xf32, #tpu.memory_space<vmem>>, vector<1x2xf32>
    %40 = vector.broadcast %39 : vector<1x2xf32> to vector<8x2xf32>
    %41 = arith.addf %38, %40 : vector<8x2xf32>
    %c0_31 = arith.constant 0 : index
    %c0_32 = arith.constant 0 : index
    %42 = vector.load %arg13[%c0_31, %c0_32] : memref<8x2xf32, #tpu.memory_space<vmem>>, vector<8x2xf32>
    tpu.vector_store %arg13[%c0_31, %c0_32], %41 {strides = array<i32>} : memref<8x2xf32, #tpu.memory_space<vmem>>, vector<8x2xf32>,
    return
  }
  func.func @transform_0(%arg0: i32) -> (i32, i32) {
    %c0_i32 = arith.constant 0 : i32
    %c0_i32_0 = arith.constant 0 : i32
    return %arg0, %c0_i32 : i32, i32
  }
  func.func @transform_1(%arg0: i32) -> (i32, i32) {
    %c0_i32 = arith.constant 0 : i32
    %c0_i32_0 = arith.constant 0 : i32
    return %arg0, %c0_i32 : i32, i32
  }
  func.func @transform_2(%arg0: i32) -> (i32, i32) {
    %c0_i32 = arith.constant 0 : i32
    %c0_i32_0 = arith.constant 0 : i32
    %c0_i32_1 = arith.constant 0 : i32
    return %c0_i32, %c0_i32_0 : i32, i32
  }
  func.func @transform_3(%arg0: i32) -> (i32, i32) {
    %c0_i32 = arith.constant 0 : i32
    %c0_i32_0 = arith.constant 0 : i32
    %c0_i32_1 = arith.constant 0 : i32
    return %c0_i32, %c0_i32_0 : i32, i32
  }
  func.func @transform_4(%arg0: i32) -> (i32, i32) {
    %c0_i32 = arith.constant 0 : i32
    %c0_i32_0 = arith.constant 0 : i32
    %c0_i32_1 = arith.constant 0 : i32
    return %c0_i32, %c0_i32_0 : i32, i32
  }
  func.func @transform_5(%arg0: i32) -> (i32, i32) {
    %c0_i32 = arith.constant 0 : i32
    %c0_i32_0 = arith.constant 0 : i32
    %c0_i32_1 = arith.constant 0 : i32
    return %c0_i32, %c0_i32_0 : i32, i32
  }
  func.func @transform_6(%arg0: i32) -> (i32, i32) {
    %c0_i32 = arith.constant 0 : i32
    %c0_i32_0 = arith.constant 0 : i32
    %c0_i32_1 = arith.constant 0 : i32
    return %c0_i32, %c0_i32_0 : i32, i32
  }
  func.func @transform_7(%arg0: i32) -> (i32, i32) {
    %c0_i32 = arith.constant 0 : i32
    %c0_i32_0 = arith.constant 0 : i32
    %c0_i32_1 = arith.constant 0 : i32
    return %c0_i32, %c0_i32_0 : i32, i32
  }
  func.func @transform_8(%arg0: i32) -> (i32, i32) {
    %c0_i32 = arith.constant 0 : i32
    %c0_i32_0 = arith.constant 0 : i32
    %c0_i32_1 = arith.constant 0 : i32
    return %c0_i32, %c0_i32_0 : i32, i32
  }
  func.func @transform_9(%arg0: i32) -> (i32, i32) {
    %c0_i32 = arith.constant 0 : i32
    %c0_i32_0 = arith.constant 0 : i32
    %c0_i32_1 = arith.constant 0 : i32
    return %c0_i32, %c0_i32_0 : i32, i32
  }
  func.func @transform_10(%arg0: i32) -> (i32, i32) {
    %c0_i32 = arith.constant 0 : i32
    %c0_i32_0 = arith.constant 0 : i32
    %c0_i32_1 = arith.constant 0 : i32
    return %c0_i32, %c0_i32_0 : i32, i32
  }
  func.func @transform_11(%arg0: i32) -> (i32, i32) {
    %c0_i32 = arith.constant 0 : i32
    %c0_i32_0 = arith.constant 0 : i32
    %c0_i32_1 = arith.constant 0 : i32
    return %c0_i32, %c0_i32_0 : i32, i32
  }
  func.func @transform_12(%arg0: i32) -> (i32, i32) {
    %c0_i32 = arith.constant 0 : i32
    %c0_i32_0 = arith.constant 0 : i32
    return %arg0, %c0_i32 : i32, i32
  }
}

</mosaic_0001>

<bundles_post_ra>
// kernel: critic_forward.1
= control target key start
LH: loop header
LB: loop body
LE: loop exit
PB: predicated region body
PF: predicated region fallthrough
CT: control target
= control target key end

     0   :  { %17 = vsyncpa [#allocation3], 0  ;;  %s4057_s0 = inlined_call_operand.vmem [shape: f32[8,12], index: 0, kind: input, shape index: {}]   ;;  %s4058_s1 = inlined_call_operand.vmem [shape: f32[8,4], index: 1, kind: input, shape index: {}]   ;;  %s4059_s2 = inlined_call_operand.vmem [shape: bf16[12,1024], index: 2, kind: input, shape index: {}]   ;;  %s4060_s3 = inlined_call_operand.vmem [shape: bf16[4,1024], index: 3, kind: input, shape index: {}]   ;;  %s4061_s4 = inlined_call_operand.vmem [shape: f32[1,1024], index: 4, kind: input, shape index: {}]   ;;  %s4062_s5 = inlined_call_operand.hbm [shape: bf16[512,384], index: 5, kind: input, shape index: {}]   ;;  %s4063_s6 = inlined_call_operand.vmem [shape: f32[1,384], index: 6, kind: input, shape index: {}]   ;;  %s4064_s7 = inlined_call_operand.hbm [shape: bf16[512,384], index: 7, kind: input, shape index: {}]   ;;  %s4065_s8 = inlined_call_operand.vmem [shape: f32[1,384], index: 8, kind: input, shape index: {}]   ;;  %s4066_s9 = inlined_call_operand.vmem [shape: bf16[384,2], index: 9, kind: input, shape index: {}]   ;;  %s4067_s10 = inlined_call_operand.vmem [shape: bf16[384,2], index: 10, kind: input, shape index: {}]   ;;  %s4068_s11 = inlined_call_operand.vmem [shape: f32[1,2], index: 11, kind: input, shape index: {}]   ;;  %s4069_s12 = inlined_call_operand.vmem [shape: f32[8,2], index: 12, kind: output, shape index: {}]  }
   0x1   :  { %18 = vsyncpa [#allocation5], 0  ;;  %s3643_s21 = smov [#allocation2]   ;;  %s3595_s25 = scalar_lea.hbm %s4062_s5, 12288 }
   0x2   :  { %s34_s22 = sshll.u32 %s3643_s21, 4  ;;  %p3596_p0 = scmp.ne.s32.totalorder %s4062_s5, %s3595_s25  ;;  %s35_s22 = int_to_ptr.vmem [resolvable:$true] %s34_s22 }
   0x3   :  { %p3599_p1 = scmp.lt.u32.totalorder %s3595_s25, %s4062_s5 }
   0x5   :  { %p3601_p2 = pnand %p3599_p1, %p3596_p0 }
   0x7   :  { %3604 = shalt.err (!%p3601_p2)
}
   0x8   :  { %s3605_s30 = scalar_lea.vmem %s35_s22, 12288  ;;  %p3610_p4 = scmp.lt.s32.totalorder %s35_s22, %s35_s22 }
   0x9   :  { %p3606_p3 = scmp.ne.s32.totalorder %s35_s22, %s3605_s30  ;;  %p3611_p5 = scmp.lt.s32.totalorder %s3605_s30, %s3605_s30 }
   0xb   :  { %p3612_p6 = por %p3611_p5, %p3610_p4 }
   0xd   :  { %p3613_p7 = pnand %p3612_p6, %p3606_p3 }
   0xf   :  { %3616 = shalt.err (!%p3613_p7)
}
  0x10   :  { %s3644_s13 = smov 192   ;;  %s3645_s14 = smov 12  }
  0x11   :  { %40 = dma.hbm_to_vmem [thread:$0]  %s4062_s5, 12288, %s35_s22, [#allocation3], %s3644_s13, %s3644_s13, %s3645_s14  }
  0x12   :  { %s3646_s17 = smov [#allocation4]   ;;  %s3617_s21 = scalar_lea.hbm %s4064_s7, 12288 }
  0x13   :  { %s48_s18 = sshll.u32 %s3646_s17, 4  ;;  %p3618_p8 = scmp.ne.s32.totalorder %s4064_s7, %s3617_s21  ;;  %s49_s18 = int_to_ptr.vmem [resolvable:$true] %s48_s18 }
  0x14   :  { %p3621_p9 = scmp.lt.u32.totalorder %s3617_s21, %s4064_s7 }
  0x16   :  { %p3623_p10 = pnand %p3621_p9, %p3618_p8 }
  0x18   :  { %3626 = shalt.err (!%p3623_p10)
}
  0x19   :  { %s3627_s27 = scalar_lea.vmem %s49_s18, 12288  ;;  %p3632_p12 = scmp.lt.s32.totalorder %s49_s18, %s49_s18 }
  0x1a   :  { %p3628_p11 = scmp.ne.s32.totalorder %s49_s18, %s3627_s27  ;;  %p3633_p13 = scmp.lt.s32.totalorder %s3627_s27, %s3627_s27 }
  0x1c   :  { %p3634_p0 = por %p3633_p13, %p3632_p12 }
  0x1e   :  { %p3635_p1 = pnand %p3634_p0, %p3628_p11 }
  0x20   :  { %3638 = shalt.err (!%p3635_p1)
}
  0x21   :  { %54 = dma.hbm_to_vmem [thread:$0]  %s4064_s7, 12288, %s49_s18, [#allocation5], %s3644_s13, %s3644_s13, %s3645_s14  }
  0x22   :  { %3639 = dma.done.wait [#allocation3], 12288  }
  0x23   :  { %3640 = vsyncadd [#allocation3], 4294955008 }
  0x24   :  { %3641 = dma.done.wait [#allocation5], 12288  }
  0x25   :  { %3642 = vsyncadd [#allocation5], 4294955008  ;;  %v90_v0 = vlaneseq  ;;  %v3647_v1 = vmov 1983009808   ;;  %v3648_v3 = vmov 0   ;;  %v82_v7 = vld [vmem:[%s4060_s3] sm:$0xff] }
  0x26   :  { %v88_v2 = vunpack.c.l.s4 %v3647_v1  ;;  %181 = vmatprep.mubr.bf16.mxu0 %v3648_v3  ;;  %222 = vmatprep.mubr.bf16.mxu1 %v3648_v3  ;;  %vm124_vm0 = vcmask 1041408   ;;  %v83_v8 = vld [vmem:[%s4060_s3 + $0x8] sm:$0xff]  ;;  %v86_v11 = vcombine.high %v82_v7, %v82_v7  ;;  %v72_v12 = vld [vmem:[%s4058_s1] sm:$0xff]  ;;  %vm120_vm1 = vcmask 31744   ;;  %v76_v32 = vld [vmem:[%s4059_s2 + $0x10] sm:$0xff] }
  0x27   :  { %v3742_v4 = vshrl.u32 %v90_v0, 7  ;;  %v103_v13 = vcombine.high %v83_v8, %v83_v8  ;;  %v74_v17 = vld [vmem:[%s4059_s2] sm:$0xff]  ;;  %v73_v21 = vpack.c.bf16 %v72_v12, %v72_v12  ;;  %v75_v24 = vld [vmem:[%s4059_s2 + $0x8] sm:$0xff]  ;;  %vm349_vm2 = vcmask 1045504   ;;  %v80_v33 = vld [vmem:[%s4059_s2 + $0x30] sm:$0x33] }
  0x28   :  { %v89_v5 = vunpack.c.0.s8 %v88_v2  ;;  %v78_v18 = vld [vmem:[%s4059_s2 + $0x20] sm:$0x33]  ;;  %v79_v28 = vld [vmem:[%s4059_s2 + $0x28] sm:$0x33]  ;;  %v77_v35 = vld [vmem:[%s4059_s2 + $0x18] sm:$0xff]  ;;  %v2827_v37 = vcombine.high %v76_v32, %v80_v33  ;;  %v2826_v42 = vcombine.low %v76_v32, %v80_v33  ;;  %vm345_vm3 = vcmask 97280  }
  0x29   :  { %v2823_v26 = vcombine.high %v74_v17, %v78_v18  ;;  %v2825_v30 = vcombine.high %v75_v24, %v79_v28  ;;  %v2822_v31 = vcombine.low %v74_v17, %v78_v18  ;;  %v2824_v34 = vcombine.low %v75_v24, %v79_v28  ;;  %v81_v38 = vld [vmem:[%s4059_s2 + $0x38] sm:$0x33]  ;;  %v70_v39 = vld [vmem:[%s4057_s0] sm:$0xff]  ;;  %v3318_v47 = vld [vmem:[#allocation2 + $0xc8] ss:$12 sps:$4 sm:$0xff]  }
  0x2a   :  { %v92_v6 = vsub.s32 %v89_v5, %v3742_v4  ;;  %v2829_v41 = vcombine.high %v77_v35, %v81_v38  ;;  %v71_v43 = vpack.c.bf16 %v70_v39, %v70_v39  ;;  %v3293_v44 = vld [vmem:[#allocation2 + $0x4] ss:$12 sps:$4 sm:$0xff]   ;;  %v2828_v45 = vcombine.low %v77_v35, %v81_v38  ;;  %v3291_v49 = vld [vmem:[#allocation2] ss:$12 sps:$4 sm:$0xff]   ;;  %v3296_v50 = vld [vmem:[#allocation2 + $0x1c] ss:$12 sps:$4 sm:$0xff]  }
  0x2b   :  { %v351_v36 = vsel %vm349_vm2, %v2822_v31, 0  ;;  %v357_v40 = vsel %vm349_vm2, %v2824_v34, 0  ;;  %v363_v46 = vsel %vm349_vm2, %v2826_v42, 0  ;;  %v3319_v51 = vld [vmem:[#allocation2 + $0x8] ss:$12 sps:$4 sm:$0xff]   ;;  %vm3650_vm4 = vmmov 0  }
  0x2c   :  { %v93_v9 = vrot.slane %v82_v7, %v92_v6  ;;  %v110_v10 = vrot.slane %v83_v8, %v92_v6  ;;  %v100_v19 = vrot.slane %v86_v11, %v92_v6  ;;  %v117_v20 = vrot.slane %v103_v13, %v92_v6  ;;  %v3294_v52 = vld [vmem:[#allocation2 + $0x18] ss:$12 sps:$4 sm:$0xff]   ;;  %v3323_v53 = vld [vmem:[#allocation2 + $0xe0] ss:$12 sps:$4 sm:$0xff]   ;;  %v3297_v56 = vld [vmem:[#allocation2 + $0x30] ss:$12 sps:$4 sm:$0xff]  }
  0x2d   :  { %v369_v48 = vsel %vm349_vm2, %v2828_v45, 0  ;;  %v3299_v54 = vld [vmem:[#allocation2 + $0x34] ss:$12 sps:$4 sm:$0xff]   ;;  %v3302_v57 = vld [vmem:[#allocation2 + $0x4c] ss:$12 sps:$4 sm:$0xff]   ;;  %vm2806_vm5 = vcmask 15360  }
  0x2e   :  { %v101_v14 = vcombine.high %v93_v9, %v93_v9  ;;  %v126_v15 = vsel %vm124_vm0, %v93_v9, 0  ;;  %v118_v16 = vcombine.high %v110_v10, %v110_v10  ;;  %v102_v22 = vcombine.high %v100_v19, %v100_v19  ;;  %v3324_v55 = vld [vmem:[#allocation2 + $0x20] ss:$12 sps:$4 sm:$0xff]   ;;  %v3300_v58 = vld [vmem:[#allocation2 + $0x48] ss:$12 sps:$4 sm:$0xff]  }
  0x2f   :  { %v132_v23 = vsel %vm124_vm0, %v100_v19, 0  ;;  %v138_v25 = vsel %vm124_vm0, %v110_v10, 0  ;;  %v119_v27 = vcombine.high %v117_v20, %v117_v20  ;;  %v144_v29 = vsel %vm124_vm0, %v117_v20, 0  ;;  %v3305_v59 = vld [vmem:[#allocation2 + $0x64] ss:$12 sps:$4 sm:$0xff]  }
  0x30   :  { %2814 = vmatprep.subr.msk.bf16.mxu0 %vm124_vm0, %v101_v14  ;;  %2816 = vmatprep.subr.msk.bf16.mxu1 %vm124_vm0, %v102_v22  ;;  %v3303_v60 = vld [vmem:[#allocation2 + $0x60] ss:$12 sps:$4 sm:$0xff]   ;;  %v3308_v61 = vld [vmem:[#allocation2 + $0x7c] ss:$12 sps:$4 sm:$0xff]   ;;  %v3306_v62 = vld [vmem:[#allocation2 + $0x78] ss:$12 sps:$4 sm:$0xff]  }
  0x31   :  { %150 = vmatpush1.bf16.msra.mxu0 %v126_v15  ;;  %191 = vmatpush1.bf16.msra.mxu1 %v132_v23  ;;  %v3311_v63 = vld [vmem:[#allocation2 + $0x94] ss:$12 sps:$4 sm:$0xff]   ;;  %v3309_v0 = vld [vmem:[#allocation2 + $0x90] ss:$12 sps:$4 sm:$0xff]   ;;  %v3314_v1 = vld [vmem:[#allocation2 + $0xac] ss:$12 sps:$4 sm:$0xff]  }
  0x32   :  { %2818 = vmatprep.subr.msk.bf16.mxu0 %vm124_vm0, %v118_v16  ;;  %2820 = vmatprep.subr.msk.bf16.mxu1 %vm124_vm0, %v119_v27  ;;  %v3312_v2 = vld [vmem:[#allocation2 + $0xa8] ss:$12 sps:$4 sm:$0xff]   ;;  %v3315_v5 = vld [vmem:[#allocation2 + $0xc0] ss:$12 sps:$4 sm:$0xff]   ;;  %v3320_v7 = vld [vmem:[#allocation2 + $0xd8] ss:$12 sps:$4 sm:$0xff]  }
  0x33   :  { %v3322_v6 = vld [vmem:[#allocation2 + $0xdc] ss:$12 sps:$4 sm:$0xff]   ;;  %v3327_v8 = vld [vmem:[#allocation2 + $0xf4] ss:$12 sps:$4 sm:$0xff]   ;;  %v3328_v9 = vld [vmem:[#allocation2 + $0xf8] ss:$12 sps:$4 sm:$0xff]  }
  0x34   :  { %2815 = vmatmul.mubr.msk.bf16.vlgmr.msra.gmra.mrb[0].mxu0 %vm120_vm1, %v73_v21  ;;  %2817 = vmatmul.mubr.msk.bf16.vlgmr.msra.gmra.mrb[0].mxu1 %vm120_vm1, %v73_v21  ;;  %v3325_v10 = vld [vmem:[#allocation2 + $0xf0] ss:$12 sps:$4 sm:$0xff]   ;;  %v3329_v11 = vld [vmem:[#allocation2 + $0x38] ss:$12 sps:$4 sm:$0xff]   ;;  %v3330_v12 = vld [vmem:[#allocation2 + $0x108] ss:$12 sps:$4 sm:$0xff]  }
  0x35   :  { %232 = vmatpush1.bf16.msra.mxu0 %v138_v25  ;;  %263 = vmatprep.mubr.bf16.mxu0 %v3648_v3  ;;  %v3332_v13 = vld [vmem:[#allocation2 + $0x10c] ss:$12 sps:$4 sm:$0xff]   ;;  %v3333_v14 = vld [vmem:[#allocation2 + $0x110] ss:$12 sps:$4 sm:$0xff]   ;;  %v3338_v17 = vld [vmem:[#allocation2 + $0x128] ss:$12 sps:$4 sm:$0xff]  }
  0x36   :  { %2830 = vmatprep.subr.msk.bf16.mxu0 %vm349_vm2, %v2823_v26  ;;  %273 = vmatpush1.bf16.msra.mxu1 %v144_v29  ;;  %v3334_v15 = vld [vmem:[#allocation2 + $0x50] ss:$12 sps:$4 sm:$0xff]   ;;  %v3335_v18 = vld [vmem:[#allocation2 + $0x120] ss:$12 sps:$4 sm:$0xff]   ;;  %v3339_v19 = vld [vmem:[#allocation2 + $0x68] ss:$12 sps:$4 sm:$0xff]  }
  0x37   :  { %304 = vmatprep.mubr.bf16.mxu1 %v3648_v3  ;;  %2832 = vmatprep.subr.msk.bf16.mxu1 %vm349_vm2, %v2825_v30  ;;  %v3337_v16 = vld [vmem:[#allocation2 + $0x124] ss:$12 sps:$4 sm:$0xff]   ;;  %v3343_v22 = vld [vmem:[#allocation2 + $0x140] ss:$12 sps:$4 sm:$0xff]   ;;  %v3350_v30 = vld [vmem:[#allocation2 + $0x168] ss:$12 sps:$4 sm:$0xff]  }
  0x38   :  { %v3340_v20 = vld [vmem:[#allocation2 + $0x138] ss:$12 sps:$4 sm:$0xff]   ;;  %v3344_v23 = vld [vmem:[#allocation2 + $0x80] ss:$12 sps:$4 sm:$0xff]   ;;  %v3345_v26 = vld [vmem:[#allocation2 + $0x150] ss:$12 sps:$4 sm:$0xff]  }
  0x39   :  { %v3347_v24 = vld [vmem:[#allocation2 + $0x154] ss:$12 sps:$4 sm:$0xff]   ;;  %v3348_v25 = vld [vmem:[#allocation2 + $0x158] ss:$12 sps:$4 sm:$0xff]   ;;  %v3353_v29 = vld [vmem:[#allocation2 + $0x170] ss:$12 sps:$4 sm:$0xff]  }
  0x3a   :  { %v3349_v27 = vld [vmem:[#allocation2 + $0x98] ss:$12 sps:$4 sm:$0xff]   ;;  %v3354_v31 = vld [vmem:[#allocation2 + $0xb0] ss:$12 sps:$4 sm:$0xff]   ;;  %v3358_v33 = vld [vmem:[#allocation2 + $0x248] ss:$12 sps:$4 sm:$0xff]  }
  0x3b   :  { %v3352_v28 = vld [vmem:[#allocation2 + $0x16c] ss:$12 sps:$4 sm:$0xff]   ;;  %v3357_v32 = vld [vmem:[#allocation2 + $0x184] ss:$12 sps:$4 sm:$0xff]  }
  0x3c   :  { %2819 = vmatmul.mubr.msk.bf16.vlgmr.msra.gmra.mrb[4].mxu0 %vm120_vm1, %v73_v21  ;;  %2821 = vmatmul.mubr.msk.bf16.vlgmr.msra.gmra.mrb[4].mxu1 %vm120_vm1, %v73_v21  ;;  %v3342_v21 = vld [vmem:[#allocation2 + $0x13c] ss:$12 sps:$4 sm:$0xff]  }
  0x3d   :  { %375 = vmatpush1.bf16.msra.mxu0 %v351_v36  ;;  %406 = vmatprep.mubr.bf16.mxu0 %v3648_v3 }
  0x3e   :  { %2834 = vmatprep.subr.msk.bf16.mxu0 %vm349_vm2, %v2827_v37  ;;  %416 = vmatpush1.bf16.msra.mxu1 %v357_v40 }
  0x3f   :  { %447 = vmatprep.mubr.bf16.mxu1 %v3648_v3  ;;  %2836 = vmatprep.subr.msk.bf16.mxu1 %vm349_vm2, %v2829_v41 }
  0x44   :  { %2831 = vmatmul.mubr.msk.bf16.vlgmr.msra.gmra.mrb[8].mxu0 %vm345_vm3, %v71_v43  ;;  %2833 = vmatmul.mubr.msk.bf16.vlgmr.msra.gmra.mrb[8].mxu1 %vm345_vm3, %v71_v43 }
  0x45   :  { %457 = vmatpush1.bf16.msra.mxu0 %v363_v46  ;;  %488 = vmatprep.mubr.bf16.mxu0 %v3648_v3  ;;  %v3812_v46 = vsub.s32 0, %v3742_v4 }
  0x46   :  { %1261 = vmatprep.subr.bf16.mxu0 %v3293_v44  ;;  %498 = vmatpush1.bf16.msra.mxu1 %v369_v48  ;;  %v3817_v48 = vld [vmem:[%s4061_s4] sm:$0xff] }
  0x47   :  { %529 = vmatprep.mubr.bf16.mxu1 %v3648_v3  ;;  %3079 = vmatprep.subr.bf16.mxu1 %v3318_v47  ;;  %v3317_v3 = vld [vmem:[#allocation2 + $0xc4] ss:$12 sps:$4 sm:$0xff]  }
  0x4c   :  { %2835 = vmatmul.mubr.msk.bf16.vlgmr.msra.gmra.mrb[12].mxu0 %vm345_vm3, %v71_v43  ;;  %2837 = vmatmul.mubr.msk.bf16.vlgmr.msra.gmra.mrb[12].mxu1 %vm345_vm3, %v71_v43 }
  0x4d   :  { %1262 = vmatpush1.bf16.msra.mxu0 %v3291_v49  ;;  %3080 = vmatpush3.bf16.msra.mxu1 %v3319_v51  ;;  %v3820_v49 = vsub.s32 1, %v3742_v4 }
  0x4e   :  { %1263 = vmatprep.subr.bf16.mxu0 %v3296_v50  ;;  %3081 = vmatprep.subr.bf16.mxu1 %v3323_v53  ;;  %v543_v53 = vrot.slane %v3817_v48, %v3812_v46 }
  0x51   :  { %1264 = vmatpush1.bf16.msra.mxu0 %v3294_v52  ;;  %3082 = vmatpush3.bf16.msra.mxu1 %v3324_v55 }
  0x52   :  { %1265 = vmatprep.subr.bf16.mxu0 %v3299_v54  ;;  %3083 = vmatprep.subr.bf16.mxu1 %v3328_v9  ;;  %v554_v54 = vsub.s32 3, %v3742_v4 }
  0x55   :  { %1266 = vmatpush1.bf16.msra.mxu0 %v3297_v56  ;;  %3084 = vmatpush3.bf16.msra.mxu1 %v3329_v11  ;;  %v547_v56 = vrot.slane %v3817_v48, %v3820_v49  ;;  %v566_v11 = vsub.s32 6, %v3742_v4 }
  0x56   :  { %1267 = vmatprep.subr.bf16.mxu0 %v3302_v57  ;;  %3085 = vmatprep.subr.bf16.mxu1 %v3333_v14  ;;  %v570_v14 = vsub.s32 7, %v3742_v4 }
  0x59   :  { %1268 = vmatpush1.bf16.msra.mxu0 %v3300_v58  ;;  %3086 = vmatpush3.bf16.msra.mxu1 %v3334_v15 }
  0x5a   :  { %1269 = vmatprep.subr.bf16.mxu0 %v3305_v59  ;;  %3087 = vmatprep.subr.bf16.mxu1 %v3338_v17  ;;  %v3355_v17 = vld [vmem:[#allocation2 + $0x180] ss:$12 sps:$4 sm:$0xff]  }
  0x5d   :  { %1270 = vmatpush1.bf16.msra.mxu0 %v3303_v60  ;;  %3088 = vmatpush3.bf16.msra.mxu1 %v3339_v19 }
  0x5e   :  { %1271 = vmatprep.subr.bf16.mxu0 %v3308_v61  ;;  %3089 = vmatprep.subr.bf16.mxu1 %v3343_v22  ;;  %v3362_v22 = vld [vmem:[#allocation2 + $0x19c] ss:$12 sps:$4 sm:$0xff]  }
  0x61   :  { %1272 = vmatpush1.bf16.msra.mxu0 %v3306_v62  ;;  %3090 = vmatpush3.bf16.msra.mxu1 %v3344_v23  ;;  %v3363_v23 = vld [vmem:[#allocation2 + $0x260] ss:$12 sps:$4 sm:$0xff]  }
  0x62   :  { %1273 = vmatprep.subr.bf16.mxu0 %v3311_v63  ;;  %3091 = vmatprep.subr.bf16.mxu1 %v3348_v25  ;;  %v558_v63 = vsub.s32 4, %v3742_v4 }
  0x65   :  { %1274 = vmatpush1.bf16.msra.mxu0 %v3309_v0  ;;  %3092 = vmatpush3.bf16.msra.mxu1 %v3349_v27 }
  0x66   :  { %1275 = vmatprep.subr.bf16.mxu0 %v3314_v1  ;;  %3093 = vmatprep.subr.bf16.mxu1 %v3353_v29  ;;  %v555_v1 = vrot.slane %v3817_v48, %v554_v54  ;;  %v3378_v54 = vld [vmem:[#allocation2 + $0x2a8] ss:$12 sps:$4 sm:$0xff]  }
  0x69   :  { %1276 = vmatpush1.bf16.msra.mxu0 %v3312_v2  ;;  %3094 = vmatpush3.bf16.msra.mxu1 %v3354_v31  ;;  %v571_v31 = vrot.slane %v3817_v48, %v570_v14 }
  0x6a   :  { %1277 = vmatprep.subr.bf16.mxu0 %v3317_v3  ;;  %3101 = vmatprep.subr.bf16.mxu1 %v3358_v33  ;;  %v3360_v33 = vld [vmem:[#allocation2 + $0x198] ss:$12 sps:$4 sm:$0xff]  }
  0x6d   :  { %1278 = vmatpush1.bf16.msra.mxu0 %v3315_v5 }
  0x6e   :  { %1279 = vmatprep.subr.bf16.mxu0 %v3322_v6 }
  0x71   :  { %1280 = vmatpush1.bf16.msra.mxu0 %v3320_v7 }
  0x72   :  { %1281 = vmatprep.subr.bf16.mxu0 %v3327_v8 }
  0x75   :  { %1282 = vmatpush1.bf16.msra.mxu0 %v3325_v10 }
  0x76   :  { %1283 = vmatprep.subr.bf16.mxu0 %v3332_v13 }
  0x79   :  { %1284 = vmatpush1.bf16.msra.mxu0 %v3330_v12  ;;  %v559_v12 = vrot.slane %v3817_v48, %v558_v63 }
  0x7a   :  { %1285 = vmatprep.subr.bf16.mxu0 %v3337_v16 }
  0x7d   :  { %1286 = vmatpush1.bf16.msra.mxu0 %v3335_v18  ;;  %v3359_v18 = vld [vmem:[#allocation2 + $0x188] ss:$12 sps:$4 sm:$0xff]  }
  0x7e   :  { %1287 = vmatprep.subr.bf16.mxu0 %v3342_v21 }
  0x81   :  { %1288 = vmatpush1.bf16.msra.mxu0 %v3340_v20 }
  0x82   :  { %1289 = vmatprep.subr.bf16.mxu0 %v3347_v24 }
  0x85   :  { %1290 = vmatpush1.bf16.msra.mxu0 %v3345_v26  ;;  %v567_v26 = vrot.slane %v3817_v48, %v566_v11  ;;  %v3394_v11 = vld [vmem:[#allocation2 + $0x230] ss:$12 sps:$4 sm:$0xff]  }
  0x86   :  { %1291 = vmatprep.subr.bf16.mxu0 %v3352_v28 }
  0x89   :  { %1292 = vmatpush1.bf16.msra.mxu0 %v3350_v30 }
  0x8a   :  { %1302 = vmatprep.subr.bf16.mxu0 %v3357_v32 }
 0x107   :  { %v183_v34 = vpop.f32.mrb[0].mxu0  ;;  %v224_v38 = vpop.f32.mrb[0].mxu1 }
 0x108   :  { %v185_v35 = vpop.f32.mrb[1].mxu0  ;;  %v226_v39 = vpop.f32.mrb[1].mxu1 }
 0x109   :  { %v187_v36 = vpop.f32.mrb[2].mxu0  ;;  %v228_v40 = vpop.f32.mrb[2].mxu1 }
 0x10a   :  { %v188_v37 = vpop.f32.mrb[3].mxu0  ;;  %v229_v41 = vpop.f32.mrb[3].mxu1 }
 0x10b   :  { %v3367_v37 = vld [vmem:[#allocation2 + $0x1b4] ss:$12 sps:$4 sm:$0xff]  }
 0x10f   :  { %v265_v42 = vpop.f32.mrb[4].mxu0  ;;  %v306_v47 = vpop.f32.mrb[4].mxu1 }
 0x110   :  { %v267_v43 = vpop.f32.mrb[5].mxu0  ;;  %v308_v50 = vpop.f32.mrb[5].mxu1 }
 0x111   :  { %v269_v44 = vpop.f32.mrb[6].mxu0  ;;  %v310_v51 = vpop.f32.mrb[6].mxu1 }
 0x112   :  { %v270_v45 = vpop.f32.mrb[7].mxu0  ;;  %v311_v52 = vpop.f32.mrb[7].mxu1  ;;  %v3365_v44 = vld [vmem:[#allocation2 + $0x1b0] ss:$12 sps:$4 sm:$0xff]  }
 0x113   :  { %v3369_v45 = vld [vmem:[#allocation2 + $0x1b8] ss:$12 sps:$4 sm:$0xff]   ;;  %v3373_v51 = vld [vmem:[#allocation2 + $0x290] ss:$12 sps:$4 sm:$0xff]   ;;  %v3370_v52 = vld [vmem:[#allocation2 + $0x1c8] ss:$12 sps:$4 sm:$0xff]  }
 0x117   :  { %v408_v55 = vpop.f32.mrb[8].mxu0  ;;  %v449_v0 = vpop.f32.mrb[8].mxu1 }
 0x118   :  { %v409_v57 = vadd.f32 %v408_v55, %v183_v34  ;;  %v410_v58 = vpop.f32.mrb[9].mxu0  ;;  %v3829_v3 = vadd.f32 %v449_v0, %v224_v38  ;;  %v451_v5 = vpop.f32.mrb[9].mxu1  ;;  %v3364_v34 = vld [vmem:[#allocation2 + $0x1a0] ss:$12 sps:$4 sm:$0xff]   ;;  %v3368_v38 = vld [vmem:[#allocation2 + $0x278] ss:$12 sps:$4 sm:$0xff]  }
 0x119   :  { %v411_v59 = vadd.f32 %v410_v58, %v185_v35  ;;  %v412_v60 = vpop.f32.mrb[10].mxu0  ;;  %v452_v7 = vadd.f32 %v451_v5, %v226_v39  ;;  %v453_v8 = vpop.f32.mrb[10].mxu1  ;;  %v3375_v55 = vld [vmem:[#allocation2 + $0x1e0] ss:$12 sps:$4 sm:$0xff]   ;;  %v3382_v58 = vld [vmem:[#allocation2 + $0x1fc] ss:$12 sps:$4 sm:$0xff]  }
 0x11a   :  { %v580_v61 = vadd.f32 %v543_v53, %v409_v57  ;;  %v413_v62 = vpop.f32.mrb[11].mxu0  ;;  %v454_v10 = vpop.f32.mrb[11].mxu1  ;;  %v3377_v53 = vld [vmem:[#allocation2 + $0x1e4] ss:$12 sps:$4 sm:$0xff]   ;;  %v3845_v57 = vsub.s32 2, %v3742_v4  ;;  %v562_v60 = vsub.s32 5, %v3742_v4 }
 0x11b   :  { %v581_v2 = vadd.f32 %v547_v56, %v411_v59  ;;  %v583_v13 = vadd.f32 %v555_v1, %v452_v7  ;;  %v3379_v56 = vld [vmem:[#allocation2 + $0x1e8] ss:$12 sps:$4 sm:$0xff]   ;;  %v3383_v59 = vld [vmem:[#allocation2 + $0x2c0] ss:$12 sps:$4 sm:$0xff]   ;;  %v3388_v1 = vld [vmem:[#allocation2 + $0x2d8] ss:$12 sps:$4 sm:$0xff]  }
 0x11c   :  { %v588_v6 = vmax.f32 %v580_v61, 0.0  ;;  %v3380_v61 = vld [vmem:[#allocation2 + $0x1f8] ss:$12 sps:$4 sm:$0xff]   ;;  %v3384_v62 = vld [vmem:[#allocation2 + $0x200] ss:$12 sps:$4 sm:$0xff]   ;;  %v551_v63 = vrot.slane %v3817_v48, %v3845_v57 }
 0x11d   :  { %v589_v9 = vmax.f32 %v581_v2, 0.0  ;;  %v591_v24 = vmax.f32 %v583_v13, 0.0  ;;  %v3387_v0 = vld [vmem:[#allocation2 + $0x214] ss:$12 sps:$4 sm:$0xff]   ;;  %v563_v2 = vrot.slane %v3817_v48, %v562_v60  ;;  %v3385_v5 = vld [vmem:[#allocation2 + $0x210] ss:$12 sps:$4 sm:$0xff]  }
 0x11e   :  { %v596_v19 = vpack.c.bf16 %v588_v6, %v588_v6  ;;  %v3389_v6 = vld [vmem:[#allocation2 + $0x218] ss:$12 sps:$4 sm:$0xff]   ;;  %v582_v7 = vadd.f32 %v551_v63, %v3829_v3  ;;  %v3393_v8 = vld [vmem:[#allocation2 + $0x2f0] ss:$12 sps:$4 sm:$0xff]   ;;  %v3390_v10 = vld [vmem:[#allocation2 + $0x228] ss:$12 sps:$4 sm:$0xff]  }
 0x11f   :  { %v597_v15 = vpack.c.bf16 %v589_v9, %v589_v9  ;;  %v490_v16 = vpop.f32.mrb[12].mxu0  ;;  %v599_v29 = vpack.c.bf16 %v591_v24, %v591_v24  ;;  %v531_v30 = vpop.f32.mrb[12].mxu1  ;;  %v3392_v4 = vld [vmem:[#allocation2 + $0x22c] ss:$12 sps:$4 sm:$0xff]   ;;  %v3397_v48 = vld [vmem:[#allocation2 + $0x244] ss:$12 sps:$4 sm:$0xff]  }
 0x120   :  { %v491_v20 = vadd.f32 %v490_v16, %v265_v42  ;;  %v492_v21 = vpop.f32.mrb[13].mxu0  ;;  %v532_v35 = vadd.f32 %v531_v30, %v306_v47  ;;  %v533_v36 = vpop.f32.mrb[13].mxu1  ;;  %v3372_v47 = vld [vmem:[#allocation2 + $0x1cc] ss:$12 sps:$4 sm:$0xff]   ;;  %v3400_v13 = vld [vmem:[#allocation4 + $0x4] ss:$12 sps:$4 sm:$0xff]  }
 0x121   :  { %v3834_v25 = vadd.f32 %v492_v21, %v267_v43  ;;  %1293 = vmatprep.mubr.bf16.mxu0 %v597_v15  ;;  %1375 = vmatprep.mubr.bf16.mxu1 %v597_v15  ;;  %v494_v27 = vpop.f32.mrb[14].mxu0  ;;  %v534_v39 = vadd.f32 %v533_v36, %v308_v50  ;;  %v535_v40 = vpop.f32.mrb[14].mxu1  ;;  %v3374_v50 = vld [vmem:[#allocation2 + $0x1d0] ss:$12 sps:$4 sm:$0xff]   ;;  %v3395_v15 = vld [vmem:[#allocation2 + $0x240] ss:$12 sps:$4 sm:$0xff]  }
 0x122   :  { %v3837_v28 = vadd.f32 %v559_v12, %v491_v20  ;;  %1294 = vmatmul.mubr.bf16.vlgmr.msra.gmra.mrb[16].mxu0 %v596_v19  ;;  %1376 = vmatmul.mubr.bf16.vlgmr.msra.gmra.mrb[16].mxu1 %v596_v19  ;;  %v495_v32 = vpop.f32.mrb[15].mxu0  ;;  %v3840_v41 = vadd.f32 %v567_v26, %v532_v35  ;;  %v536_v42 = vpop.f32.mrb[15].mxu1  ;;  %v590_v12 = vmax.f32 %v582_v7, 0.0  ;;  %v3398_v3 = vld [vmem:[#allocation4] ss:$12 sps:$4 sm:$0xff]  }
 0x123   :  { %1303 = vmatpush1.bf16.msra.mxu0 %v3355_v17  ;;  %3102 = vmatpush3.bf16.msra.mxu1 %v3359_v18  ;;  %v3842_v43 = vadd.f32 %v571_v31, %v534_v39  ;;  %v585_v9 = vadd.f32 %v563_v2, %v3834_v25  ;;  %v3403_v17 = vld [vmem:[#allocation2 + $0x25c] ss:$12 sps:$4 sm:$0xff]   ;;  %v3401_v20 = vld [vmem:[#allocation2 + $0x258] ss:$12 sps:$4 sm:$0xff]   ;;  %v3433_v39 = vld [vmem:[#allocation2 + $0x2d4] ss:$12 sps:$4 sm:$0xff]  }
 0x124   :  { %1304 = vmatprep.subr.bf16.mxu0 %v3362_v22  ;;  %3103 = vmatprep.subr.bf16.mxu1 %v3363_v23  ;;  %v3853_v16 = vpack.c.bf16 %v590_v12, %v590_v12  ;;  %v3406_v18 = vld [vmem:[#allocation4 + $0x1c] ss:$12 sps:$4 sm:$0xff]   ;;  %v3404_v21 = vld [vmem:[#allocation4 + $0x18] ss:$12 sps:$4 sm:$0xff]   ;;  %v3409_v22 = vld [vmem:[#allocation2 + $0x274] ss:$12 sps:$4 sm:$0xff]  }
 0x125   :  { %1334 = vmatprep.mubr.bf16.mxu0 %v599_v29  ;;  %1415 = vmatprep.mubr.bf16.mxu1 %v599_v29  ;;  %v593_v14 = vmax.f32 %v585_v9, 0.0  ;;  %v3412_v23 = vld [vmem:[#allocation4 + $0x34] ss:$12 sps:$4 sm:$0xff]   ;;  %v3407_v24 = vld [vmem:[#allocation2 + $0x270] ss:$12 sps:$4 sm:$0xff]  }
 0x126   :  { %v3410_v25 = vld [vmem:[#allocation4 + $0x30] ss:$12 sps:$4 sm:$0xff]   ;;  %v3415_v26 = vld [vmem:[#allocation2 + $0x28c] ss:$12 sps:$4 sm:$0xff]   ;;  %v3413_v29 = vld [vmem:[#allocation2 + $0x288] ss:$12 sps:$4 sm:$0xff]  }
 0x127   :  { %1305 = vmatpush1.bf16.msra.mxu0 %v3360_v33  ;;  %3104 = vmatpush3.bf16.msra.mxu1 %v3364_v34  ;;  %v3855_v19 = vpack.c.bf16 %v593_v14, %v593_v14  ;;  %v3418_v27 = vld [vmem:[#allocation4 + $0x4c] ss:$12 sps:$4 sm:$0xff]   ;;  %v3416_v30 = vld [vmem:[#allocation4 + $0x48] ss:$12 sps:$4 sm:$0xff]   ;;  %v3421_v31 = vld [vmem:[#allocation2 + $0x2a4] ss:$12 sps:$4 sm:$0xff]  }
 0x128   :  { %1306 = vmatprep.subr.bf16.mxu0 %v3367_v37  ;;  %3105 = vmatprep.subr.bf16.mxu1 %v3368_v38  ;;  %v3424_v32 = vld [vmem:[#allocation4 + $0x64] ss:$12 sps:$4 sm:$0xff]   ;;  %v3419_v33 = vld [vmem:[#allocation2 + $0x2a0] ss:$12 sps:$4 sm:$0xff]   ;;  %v3427_v35 = vld [vmem:[#allocation2 + $0x2bc] ss:$12 sps:$4 sm:$0xff]  }
 0x129   :  { %v3422_v34 = vld [vmem:[#allocation4 + $0x60] ss:$12 sps:$4 sm:$0xff]   ;;  %v3430_v36 = vld [vmem:[#allocation4 + $0x7c] ss:$12 sps:$4 sm:$0xff]   ;;  %v3425_v37 = vld [vmem:[#allocation2 + $0x2b8] ss:$12 sps:$4 sm:$0xff]  }
 0x12a   :  { %v3428_v38 = vld [vmem:[#allocation4 + $0x78] ss:$12 sps:$4 sm:$0xff]   ;;  %v3436_v40 = vld [vmem:[#allocation4 + $0x94] ss:$12 sps:$4 sm:$0xff]   ;;  %v3431_v42 = vld [vmem:[#allocation2 + $0x2d0] ss:$12 sps:$4 sm:$0xff]  }
 0x12b   :  { %1307 = vmatpush1.bf16.msra.mxu0 %v3365_v44  ;;  %3106 = vmatpush3.bf16.msra.mxu1 %v3369_v45  ;;  %v3434_v44 = vld [vmem:[#allocation4 + $0x90] ss:$12 sps:$4 sm:$0xff]   ;;  %v3439_v45 = vld [vmem:[#allocation2 + $0x2ec] ss:$12 sps:$4 sm:$0xff]   ;;  %v3467_v9 = vld [vmem:[#allocation4 + $0x68] ss:$12 sps:$4 sm:$0xff]  }
 0x12c   :  { %1308 = vmatprep.subr.bf16.mxu0 %v3372_v47  ;;  %3107 = vmatprep.subr.bf16.mxu1 %v3373_v51  ;;  %v3442_v47 = vld [vmem:[#allocation4 + $0xac] ss:$12 sps:$4 sm:$0xff]   ;;  %v3437_v51 = vld [vmem:[#allocation2 + $0x2e8] ss:$12 sps:$4 sm:$0xff]   ;;  %v3453_v63 = vld [vmem:[#allocation4 + $0xf0] ss:$12 sps:$4 sm:$0xff]  }
 0x12d   :  { %v3452_v60 = vld [vmem:[#allocation4 + $0x20] ss:$12 sps:$4 sm:$0xff]   ;;  %v3461_v2 = vld [vmem:[#allocation4 + $0x110] ss:$12 sps:$4 sm:$0xff]   ;;  %v3468_v12 = vld [vmem:[#allocation4 + $0x138] ss:$12 sps:$4 sm:$0xff]  }
 0x12e   :  { %v3465_v7 = vld [vmem:[#allocation4 + $0x124] ss:$12 sps:$4 sm:$0xff]  }
 0x12f   :  { %1309 = vmatpush1.bf16.msra.mxu0 %v3370_v52  ;;  %3108 = vmatpush3.bf16.msra.mxu1 %v3374_v50  ;;  %v3440_v52 = vld [vmem:[#allocation4 + $0xa8] ss:$12 sps:$4 sm:$0xff]   ;;  %v3445_v50 = vld [vmem:[#allocation4 + $0xc4] ss:$12 sps:$4 sm:$0xff]  }
 0x130   :  { %1310 = vmatprep.subr.bf16.mxu0 %v3377_v53  ;;  %3109 = vmatprep.subr.bf16.mxu1 %v3378_v54  ;;  %v3446_v53 = vld [vmem:[#allocation4 + $0xc8] ss:$12 sps:$4 sm:$0xff]   ;;  %v3443_v54 = vld [vmem:[#allocation4 + $0xc0] ss:$12 sps:$4 sm:$0xff]   ;;  %v3476_v14 = vld [vmem:[#allocation4 + $0x158] ss:$12 sps:$4 sm:$0xff]  }
 0x133   :  { %1311 = vmatpush1.bf16.msra.mxu0 %v3375_v55  ;;  %3110 = vmatpush3.bf16.msra.mxu1 %v3379_v56  ;;  %v3447_v55 = vld [vmem:[#allocation4 + $0x8] ss:$12 sps:$4 sm:$0xff]  }
 0x134   :  { %1312 = vmatprep.subr.bf16.mxu0 %v3382_v58  ;;  %3111 = vmatprep.subr.bf16.mxu1 %v3383_v59  ;;  %v3450_v56 = vld [vmem:[#allocation4 + $0xdc] ss:$12 sps:$4 sm:$0xff]   ;;  %v3451_v58 = vld [vmem:[#allocation4 + $0xe0] ss:$12 sps:$4 sm:$0xff]   ;;  %v3448_v59 = vld [vmem:[#allocation4 + $0xd8] ss:$12 sps:$4 sm:$0xff]  }
 0x137   :  { %1313 = vmatpush1.bf16.msra.mxu0 %v3380_v61  ;;  %3112 = vmatpush3.bf16.msra.mxu1 %v3384_v62  ;;  %v3455_v61 = vld [vmem:[#allocation4 + $0xf4] ss:$12 sps:$4 sm:$0xff]   ;;  %v3456_v62 = vld [vmem:[#allocation4 + $0xf8] ss:$12 sps:$4 sm:$0xff]  }
 0x138   :  { %1314 = vmatprep.subr.bf16.mxu0 %v3387_v0  ;;  %3113 = vmatprep.subr.bf16.mxu1 %v3388_v1  ;;  %v3457_v0 = vld [vmem:[#allocation4 + $0x38] ss:$12 sps:$4 sm:$0xff]  }
 0x139   :  { %v3460_v1 = vld [vmem:[#allocation4 + $0x10c] ss:$12 sps:$4 sm:$0xff]  }
 0x13b   :  { %1315 = vmatpush1.bf16.msra.mxu0 %v3385_v5  ;;  %3114 = vmatpush3.bf16.msra.mxu1 %v3389_v6  ;;  %v3458_v5 = vld [vmem:[#allocation4 + $0x108] ss:$12 sps:$4 sm:$0xff]   ;;  %v3462_v6 = vld [vmem:[#allocation4 + $0x50] ss:$12 sps:$4 sm:$0xff]  }
 0x13c   :  { %1316 = vmatprep.subr.bf16.mxu0 %v3392_v4  ;;  %3115 = vmatprep.subr.bf16.mxu1 %v3393_v8  ;;  %v3466_v4 = vld [vmem:[#allocation4 + $0x128] ss:$12 sps:$4 sm:$0xff]   ;;  %v3463_v8 = vld [vmem:[#allocation4 + $0x120] ss:$12 sps:$4 sm:$0xff]  }
 0x13f   :  { %1317 = vmatpush1.bf16.msra.mxu0 %v3390_v10  ;;  %3116 = vmatpush3.bf16.msra.mxu1 %v3394_v11  ;;  %v3470_v10 = vld [vmem:[#allocation4 + $0x13c] ss:$12 sps:$4 sm:$0xff]   ;;  %v3471_v11 = vld [vmem:[#allocation4 + $0x140] ss:$12 sps:$4 sm:$0xff]  }
 0x140   :  { %1318 = vmatprep.subr.bf16.mxu0 %v3397_v48  ;;  %2086 = vmatprep.subr.bf16.mxu1 %v3400_v13  ;;  %v3472_v48 = vld [vmem:[#allocation4 + $0x80] ss:$12 sps:$4 sm:$0xff]  }
 0x141   :  { %v3475_v13 = vld [vmem:[#allocation4 + $0x154] ss:$12 sps:$4 sm:$0xff]  }
 0x142   :  { %1416 = vmatmul.mubr.bf16.vlgmr.msra.gmra.mrb[20].mxu1 %v3853_v16 }
 0x143   :  { %1319 = vmatpush1.bf16.msra.mxu0 %v3395_v15  ;;  %2087 = vmatpush1.bf16.msra.mxu1 %v3398_v3  ;;  %v3473_v15 = vld [vmem:[#allocation4 + $0x150] ss:$12 sps:$4 sm:$0xff]   ;;  %v3477_v3 = vld [vmem:[#allocation4 + $0x98] ss:$12 sps:$4 sm:$0xff]  }
 0x144   :  { %2118 = vmatprep.mubr.bf16.mxu1 %v3855_v19  ;;  %1320 = vmatprep.subr.bf16.mxu0 %v3403_v17  ;;  %v3481_v17 = vld [vmem:[#allocation4 + $0x170] ss:$12 sps:$4 sm:$0xff]  }
 0x145   :  { %2088 = vmatprep.subr.bf16.mxu1 %v3406_v18  ;;  %v3478_v18 = vld [vmem:[#allocation4 + $0x168] ss:$12 sps:$4 sm:$0xff]  }
 0x147   :  { %1321 = vmatpush1.bf16.msra.mxu0 %v3401_v20  ;;  %2089 = vmatpush1.bf16.msra.mxu1 %v3404_v21  ;;  %v592_v20 = vmax.f32 %v3837_v28, 0.0  ;;  %v3485_v21 = vld [vmem:[#allocation4 + $0x184] ss:$12 sps:$4 sm:$0xff]  }
 0x148   :  { %1322 = vmatprep.subr.bf16.mxu0 %v3409_v22  ;;  %2090 = vmatprep.subr.bf16.mxu1 %v3412_v23  ;;  %v3486_v22 = vld [vmem:[#allocation4 + $0x248] ss:$12 sps:$4 sm:$0xff]   ;;  %v595_v23 = vmax.f32 %v3842_v43, 0.0  ;;  %v3488_v28 = vld [vmem:[#allocation4 + $0x198] ss:$12 sps:$4 sm:$0xff]  }
 0x149   :  { %v3496_v43 = vld [vmem:[#allocation4 + $0x278] ss:$12 sps:$4 sm:$0xff]  }
 0x14b   :  { %1323 = vmatpush1.bf16.msra.mxu0 %v3407_v24  ;;  %2091 = vmatpush1.bf16.msra.mxu1 %v3410_v25  ;;  %v3483_v24 = vld [vmem:[#allocation4 + $0x180] ss:$12 sps:$4 sm:$0xff]   ;;  %v600_v25 = vpack.c.bf16 %v592_v20, %v592_v20 }
 0x14c   :  { %1324 = vmatprep.subr.bf16.mxu0 %v3415_v26  ;;  %2092 = vmatprep.subr.bf16.mxu1 %v3418_v27  ;;  %v3487_v26 = vld [vmem:[#allocation4 + $0x188] ss:$12 sps:$4 sm:$0xff]   ;;  %v603_v27 = vpack.c.bf16 %v595_v23, %v595_v23 }
 0x14f   :  { %1325 = vmatpush1.bf16.msra.mxu0 %v3413_v29  ;;  %2093 = vmatpush1.bf16.msra.mxu1 %v3416_v30  ;;  %v3490_v29 = vld [vmem:[#allocation4 + $0x19c] ss:$12 sps:$4 sm:$0xff]   ;;  %v3491_v30 = vld [vmem:[#allocation4 + $0x260] ss:$12 sps:$4 sm:$0xff]  }
 0x150   :  { %1326 = vmatprep.subr.bf16.mxu0 %v3421_v31  ;;  %2094 = vmatprep.subr.bf16.mxu1 %v3424_v32  ;;  %v3492_v31 = vld [vmem:[#allocation4 + $0x1a0] ss:$12 sps:$4 sm:$0xff]  }
 0x151   :  { %v3495_v32 = vld [vmem:[#allocation4 + $0x1b4] ss:$12 sps:$4 sm:$0xff]  }
 0x153   :  { %1327 = vmatpush1.bf16.msra.mxu0 %v3419_v33  ;;  %2095 = vmatpush1.bf16.msra.mxu1 %v3422_v34  ;;  %v3493_v33 = vld [vmem:[#allocation4 + $0x1b0] ss:$12 sps:$4 sm:$0xff]   ;;  %v3497_v34 = vld [vmem:[#allocation4 + $0x1b8] ss:$12 sps:$4 sm:$0xff]  }
 0x154   :  { %1328 = vmatprep.subr.bf16.mxu0 %v3427_v35  ;;  %2096 = vmatprep.subr.bf16.mxu1 %v3430_v36  ;;  %v3500_v35 = vld [vmem:[#allocation4 + $0x1cc] ss:$12 sps:$4 sm:$0xff]   ;;  %v3501_v36 = vld [vmem:[#allocation4 + $0x290] ss:$12 sps:$4 sm:$0xff]  }
 0x157   :  { %1329 = vmatpush1.bf16.msra.mxu0 %v3425_v37  ;;  %2097 = vmatpush1.bf16.msra.mxu1 %v3428_v38  ;;  %v3498_v37 = vld [vmem:[#allocation4 + $0x1c8] ss:$12 sps:$4 sm:$0xff]   ;;  %v3502_v38 = vld [vmem:[#allocation4 + $0x1d0] ss:$12 sps:$4 sm:$0xff]  }
 0x158   :  { %1330 = vmatprep.subr.bf16.mxu0 %v3433_v39  ;;  %2098 = vmatprep.subr.bf16.mxu1 %v3436_v40  ;;  %v3505_v39 = vld [vmem:[#allocation4 + $0x1e4] ss:$12 sps:$4 sm:$0xff]   ;;  %v3506_v40 = vld [vmem:[#allocation4 + $0x2a8] ss:$12 sps:$4 sm:$0xff]  }
 0x15b   :  { %1331 = vmatpush1.bf16.msra.mxu0 %v3431_v42  ;;  %2099 = vmatpush1.bf16.msra.mxu1 %v3434_v44  ;;  %v3503_v42 = vld [vmem:[#allocation4 + $0x1e0] ss:$12 sps:$4 sm:$0xff]   ;;  %v3507_v44 = vld [vmem:[#allocation4 + $0x1e8] ss:$12 sps:$4 sm:$0xff]  }
 0x15c   :  { %1332 = vmatprep.subr.bf16.mxu0 %v3439_v45  ;;  %2100 = vmatprep.subr.bf16.mxu1 %v3442_v47  ;;  %v3510_v45 = vld [vmem:[#allocation4 + $0x1fc] ss:$12 sps:$4 sm:$0xff]   ;;  %v3511_v47 = vld [vmem:[#allocation4 + $0x2c0] ss:$12 sps:$4 sm:$0xff]  }
 0x15f   :  { %1333 = vmatpush1.bf16.msra.mxu0 %v3437_v51  ;;  %2101 = vmatpush1.bf16.msra.mxu1 %v3440_v52  ;;  %v3508_v51 = vld [vmem:[#allocation4 + $0x1f8] ss:$12 sps:$4 sm:$0xff]   ;;  %v3512_v52 = vld [vmem:[#allocation4 + $0x200] ss:$12 sps:$4 sm:$0xff]  }
 0x160   :  { %2102 = vmatprep.subr.bf16.mxu1 %v3445_v50  ;;  %3123 = vmatprep.subr.bf16.mxu0 %v3446_v53  ;;  %v3515_v50 = vld [vmem:[#allocation4 + $0x214] ss:$12 sps:$4 sm:$0xff]   ;;  %v3516_v53 = vld [vmem:[#allocation4 + $0x2d8] ss:$12 sps:$4 sm:$0xff]  }
 0x162   :  { %1335 = vmatmul.mubr.bf16.vlgmr.msra.gmra.mrb[16].mxu0 %v3853_v16  ;;  %v3480_v16 = vld [vmem:[#allocation4 + $0x16c] ss:$12 sps:$4 sm:$0xff]  }
 0x163   :  { %2103 = vmatpush1.bf16.msra.mxu1 %v3443_v54  ;;  %3124 = vmatpush3.bf16.msra.mxu0 %v3447_v55  ;;  %v3513_v54 = vld [vmem:[#allocation4 + $0x210] ss:$12 sps:$4 sm:$0xff]   ;;  %v3517_v55 = vld [vmem:[#allocation4 + $0x218] ss:$12 sps:$4 sm:$0xff]  }
 0x164   :  { %2200 = vmatprep.mubr.bf16.mxu0 %v3855_v19  ;;  %2104 = vmatprep.subr.bf16.mxu1 %v3450_v56  ;;  %v3482_v19 = vld [vmem:[#allocation4 + $0xb0] ss:$12 sps:$4 sm:$0xff]   ;;  %v3520_v56 = vld [vmem:[#allocation4 + $0x22c] ss:$12 sps:$4 sm:$0xff]  }
 0x165   :  { %3125 = vmatprep.subr.bf16.mxu0 %v3451_v58  ;;  %v3521_v58 = vld [vmem:[#allocation4 + $0x2f0] ss:$12 sps:$4 sm:$0xff]  }
 0x167   :  { %2105 = vmatpush1.bf16.msra.mxu1 %v3448_v59  ;;  %3126 = vmatpush3.bf16.msra.mxu0 %v3452_v60  ;;  %v3518_v59 = vld [vmem:[#allocation4 + $0x228] ss:$12 sps:$4 sm:$0xff]   ;;  %v3522_v60 = vld [vmem:[#allocation4 + $0x230] ss:$12 sps:$4 sm:$0xff]  }
 0x168   :  { %2106 = vmatprep.subr.bf16.mxu1 %v3455_v61  ;;  %3127 = vmatprep.subr.bf16.mxu0 %v3456_v62  ;;  %v3525_v61 = vld [vmem:[#allocation4 + $0x244] ss:$12 sps:$4 sm:$0xff]   ;;  %v594_v62 = vmax.f32 %v3840_v41, 0.0 }
 0x169   :  { %v3537_v41 = vld [vmem:[#allocation4 + $0x2a4] ss:$12 sps:$4 sm:$0xff]  }
 0x16b   :  { %2107 = vmatpush1.bf16.msra.mxu1 %v3453_v63  ;;  %3128 = vmatpush3.bf16.msra.mxu0 %v3457_v0  ;;  %v3523_v63 = vld [vmem:[#allocation4 + $0x240] ss:$12 sps:$4 sm:$0xff]   ;;  %v3528_v0 = vld [vmem:[#allocation4 + $0x25c] ss:$12 sps:$4 sm:$0xff]  }
 0x16c   :  { %2108 = vmatprep.subr.bf16.mxu1 %v3460_v1  ;;  %3129 = vmatprep.subr.bf16.mxu0 %v3461_v2  ;;  %v602_v1 = vpack.c.bf16 %v594_v62, %v594_v62  ;;  %v3526_v2 = vld [vmem:[#allocation4 + $0x258] ss:$12 sps:$4 sm:$0xff]  }
 0x16f   :  { %2109 = vmatpush1.bf16.msra.mxu1 %v3458_v5  ;;  %3130 = vmatpush3.bf16.msra.mxu0 %v3462_v6  ;;  %v3531_v5 = vld [vmem:[#allocation4 + $0x274] ss:$12 sps:$4 sm:$0xff]   ;;  %v3529_v6 = vld [vmem:[#allocation4 + $0x270] ss:$12 sps:$4 sm:$0xff]  }
 0x170   :  { %2110 = vmatprep.subr.bf16.mxu1 %v3465_v7  ;;  %3131 = vmatprep.subr.bf16.mxu0 %v3466_v4  ;;  %v3534_v7 = vld [vmem:[#allocation4 + $0x28c] ss:$12 sps:$4 sm:$0xff]   ;;  %v3532_v4 = vld [vmem:[#allocation4 + $0x288] ss:$12 sps:$4 sm:$0xff]  }
 0x173   :  { %2111 = vmatpush1.bf16.msra.mxu1 %v3463_v8  ;;  %3132 = vmatpush3.bf16.msra.mxu0 %v3467_v9  ;;  %v3535_v8 = vld [vmem:[#allocation4 + $0x2a0] ss:$12 sps:$4 sm:$0xff]   ;;  %v3540_v9 = vld [vmem:[#allocation4 + $0x2bc] ss:$12 sps:$4 sm:$0xff]  }
 0x174   :  { %2112 = vmatprep.subr.bf16.mxu1 %v3470_v10  ;;  %3133 = vmatprep.subr.bf16.mxu0 %v3471_v11  ;;  %v3538_v10 = vld [vmem:[#allocation4 + $0x2b8] ss:$12 sps:$4 sm:$0xff]   ;;  %v3543_v11 = vld [vmem:[#allocation4 + $0x2d4] ss:$12 sps:$4 sm:$0xff]  }
 0x177   :  { %2113 = vmatpush1.bf16.msra.mxu1 %v3468_v12  ;;  %3134 = vmatpush3.bf16.msra.mxu0 %v3472_v48  ;;  %v3541_v12 = vld [vmem:[#allocation4 + $0x2d0] ss:$12 sps:$4 sm:$0xff]   ;;  %v3546_v48 = vld [vmem:[#allocation4 + $0x2ec] ss:$12 sps:$4 sm:$0xff]  }
 0x178   :  { %2114 = vmatprep.subr.bf16.mxu1 %v3475_v13  ;;  %3135 = vmatprep.subr.bf16.mxu0 %v3476_v14  ;;  %v3544_v13 = vld [vmem:[#allocation4 + $0x2e8] ss:$12 sps:$4 sm:$0xff]   ;;  %v3547_v14 = vld [vmem:[%s4067_s10 + $0x80] sm:$0xff]  }
 0x17b   :  { %2115 = vmatpush1.bf16.msra.mxu1 %v3473_v15  ;;  %3136 = vmatpush3.bf16.msra.mxu0 %v3477_v3  ;;  %v3649_v15 = vmov 0.0   ;;  %v3548_v3 = vld [vmem:[%s4067_s10 + $0x88] sm:$0xff]  }
 0x17c   :  { %2116 = vmatprep.subr.bf16.mxu1 %v3480_v16  ;;  %3137 = vmatprep.subr.bf16.mxu0 %v3481_v17  ;;  %v3549_v16 = vld [vmem:[%s4067_s10 + $0x90] sm:$0xff]   ;;  %v3550_v17 = vld [vmem:[%s4067_s10 + $0x98] sm:$0xff]  }
 0x17f   :  { %2117 = vmatpush1.bf16.msra.mxu1 %v3478_v18  ;;  %3138 = vmatpush3.bf16.msra.mxu0 %v3482_v19  ;;  %v3551_v18 = vld [vmem:[%s4067_s10 + $0xa0] sm:$0xff]   ;;  %v3552_v19 = vld [vmem:[%s4067_s10 + $0xa8] sm:$0xff]  }
 0x180   :  { %2127 = vmatprep.subr.bf16.mxu1 %v3485_v21  ;;  %3145 = vmatprep.subr.bf16.mxu0 %v3486_v22  ;;  %v3553_v22 = vld [vmem:[%s4067_s10 + $0xb0] sm:$0xff]  }
 0x182   :  { %2119 = vmatmul.mubr.bf16.vlgmr.msra.gmra.mrb[24].mxu1 %v600_v25  ;;  %2201 = vmatmul.mubr.bf16.vlgmr.msra.gmra.mrb[20].mxu0 %v600_v25 }
 0x183   :  { %2128 = vmatpush1.bf16.msra.mxu1 %v3483_v24  ;;  %2159 = vmatprep.mubr.bf16.mxu1 %v603_v27 }
 0x184   :  { %3146 = vmatpush3.bf16.msra.mxu0 %v3487_v26  ;;  %2240 = vmatprep.mubr.bf16.mxu0 %v603_v27  ;;  %v3554_v26 = vld [vmem:[%s4067_s10 + $0xb8] sm:$0xff]   ;;  %v3555_v27 = vld [vmem:[%s4067_s10 + $0x40] sm:$0xff]  }
 0x185   :  { %2129 = vmatprep.subr.bf16.mxu1 %v3490_v29  ;;  %3147 = vmatprep.subr.bf16.mxu0 %v3491_v30  ;;  %v3556_v29 = vld [vmem:[%s4067_s10] sm:$0xff]   ;;  %v3558_v30 = vld [vmem:[%s4067_s10 + $0x48] sm:$0xff]  }
 0x187   :  { %2130 = vmatpush1.bf16.msra.mxu1 %v3488_v28  ;;  %v3559_v28 = vld [vmem:[%s4067_s10 + $0x8] sm:$0xff]  }
 0x188   :  { %3148 = vmatpush3.bf16.msra.mxu0 %v3492_v31  ;;  %2131 = vmatprep.subr.bf16.mxu1 %v3495_v32  ;;  %v3561_v31 = vld [vmem:[%s4067_s10 + $0x50] sm:$0xff]  }
 0x189   :  { %3149 = vmatprep.subr.bf16.mxu0 %v3496_v43  ;;  %v3562_v32 = vld [vmem:[%s4067_s10 + $0x10] sm:$0xff]   ;;  %v3564_v43 = vld [vmem:[%s4067_s10 + $0x58] sm:$0xff]  }
 0x18b   :  { %2132 = vmatpush1.bf16.msra.mxu1 %v3493_v33  ;;  %v3565_v33 = vld [vmem:[%s4067_s10 + $0x18] sm:$0xff]  }
 0x18c   :  { %3150 = vmatpush3.bf16.msra.mxu0 %v3497_v34  ;;  %2133 = vmatprep.subr.bf16.mxu1 %v3500_v35  ;;  %v3567_v34 = vld [vmem:[%s4067_s10 + $0x60] sm:$0xff]  }
 0x18d   :  { %3151 = vmatprep.subr.bf16.mxu0 %v3501_v36  ;;  %v3568_v35 = vld [vmem:[%s4067_s10 + $0x20] sm:$0xff]  }
 0x18e   :  { %v3932_v36 = vld [vmem:[%s4063_s6] sm:$0x7] }
 0x18f   :  { %2134 = vmatpush1.bf16.msra.mxu1 %v3498_v37  ;;  %v3570_v37 = vld [vmem:[%s4067_s10 + $0x68] sm:$0xff]  }
 0x190   :  { %3152 = vmatpush3.bf16.msra.mxu0 %v3502_v38  ;;  %2135 = vmatprep.subr.bf16.mxu1 %v3505_v39  ;;  %v3571_v38 = vld [vmem:[%s4067_s10 + $0x28] sm:$0xff]   ;;  %v745_v39 = vrot.slane %v3932_v36, %v3845_v57 }
 0x191   :  { %3153 = vmatprep.subr.bf16.mxu0 %v3506_v40 }
 0x193   :  { %2136 = vmatpush1.bf16.msra.mxu1 %v3503_v42  ;;  %v3573_v42 = vld [vmem:[%s4067_s10 + $0x70] sm:$0xff]  }
 0x194   :  { %3154 = vmatpush3.bf16.msra.mxu0 %v3507_v44  ;;  %2137 = vmatprep.subr.bf16.mxu1 %v3510_v45  ;;  %v3574_v45 = vld [vmem:[%s4067_s10 + $0x30] sm:$0xff]  }
 0x195   :  { %3155 = vmatprep.subr.bf16.mxu0 %v3511_v47 }
 0x197   :  { %2138 = vmatpush1.bf16.msra.mxu1 %v3508_v51 }
 0x198   :  { %3156 = vmatpush3.bf16.msra.mxu0 %v3512_v52  ;;  %2139 = vmatprep.subr.bf16.mxu1 %v3515_v50 }
 0x199   :  { %3157 = vmatprep.subr.bf16.mxu0 %v3516_v53 }
 0x19b   :  { %2140 = vmatpush1.bf16.msra.mxu1 %v3513_v54  ;;  %v3576_v54 = vld [vmem:[%s4067_s10 + $0x78] sm:$0xff]  }
 0x19c   :  { %3158 = vmatpush3.bf16.msra.mxu0 %v3517_v55  ;;  %2141 = vmatprep.subr.bf16.mxu1 %v3520_v56  ;;  %v3577_v55 = vld [vmem:[%s4067_s10 + $0x38] sm:$0xff]   ;;  %v3579_v56 = vld [vmem:[%s4066_s9 + $0x40] sm:$0xff]  }
 0x19d   :  { %3159 = vmatprep.subr.bf16.mxu0 %v3521_v58 }
 0x19f   :  { %2142 = vmatpush1.bf16.msra.mxu1 %v3518_v59 }
 0x1a0   :  { %3160 = vmatpush3.bf16.msra.mxu0 %v3522_v60  ;;  %2143 = vmatprep.subr.bf16.mxu1 %v3525_v61 }
 0x1a1   :  { %3167 = vmatprep.subr.bf16.mxu0 %v3555_v27 }
 0x1a3   :  { %2241 = vmatmul.mubr.bf16.vlgmr.msra.gmra.mrb[24].mxu0 %v602_v1  ;;  %2144 = vmatpush1.bf16.msra.mxu1 %v3523_v63 }
 0x1a4   :  { %2145 = vmatprep.subr.bf16.mxu1 %v3528_v0  ;;  %3168 = vmatpush3.bf16.msra.mxu0 %v3556_v29 }
 0x1a5   :  { %3169 = vmatprep.subr.bf16.mxu0 %v3558_v30 }
 0x1a7   :  { %2146 = vmatpush1.bf16.msra.mxu1 %v3526_v2 }
 0x1a8   :  { %2147 = vmatprep.subr.bf16.mxu1 %v3531_v5  ;;  %3170 = vmatpush3.bf16.msra.mxu0 %v3559_v28  ;;  %v1557_v5 = vld [vmem:[%s4065_s8] sm:$0x7] }
 0x1a9   :  { %3171 = vmatprep.subr.bf16.mxu0 %v3561_v31 }
 0x1ab   :  { %2148 = vmatpush1.bf16.msra.mxu1 %v3529_v6  ;;  %v1570_v6 = vrot.slane %v1557_v5, %v3845_v57  ;;  %v3563_v57 = vld [vmem:[%s4066_s9 + $0x90] sm:$0xff]  }
 0x1ac   :  { %2149 = vmatprep.subr.bf16.mxu1 %v3534_v7  ;;  %3172 = vmatpush3.bf16.msra.mxu0 %v3562_v32 }
 0x1ad   :  { %3173 = vmatprep.subr.bf16.mxu0 %v3564_v43 }
 0x1af   :  { %2150 = vmatpush1.bf16.msra.mxu1 %v3532_v4 }
 0x1b0   :  { %2151 = vmatprep.subr.bf16.mxu1 %v3537_v41  ;;  %3174 = vmatpush3.bf16.msra.mxu0 %v3565_v33  ;;  %v3580_v33 = vld [vmem:[%s4066_s9] sm:$0xff]  }
 0x1b1   :  { %3175 = vmatprep.subr.bf16.mxu0 %v3567_v34 }
 0x1b3   :  { %2152 = vmatpush1.bf16.msra.mxu1 %v3535_v8 }
 0x1b4   :  { %2153 = vmatprep.subr.bf16.mxu1 %v3540_v9  ;;  %3176 = vmatpush3.bf16.msra.mxu0 %v3568_v35  ;;  %v3581_v35 = vld [vmem:[%s4066_s9 + $0x48] sm:$0xff]  }
 0x1b5   :  { %3177 = vmatprep.subr.bf16.mxu0 %v3570_v37 }
 0x1b7   :  { %2154 = vmatpush1.bf16.msra.mxu1 %v3538_v10 }
 0x1b8   :  { %2155 = vmatprep.subr.bf16.mxu1 %v3543_v11  ;;  %3178 = vmatpush3.bf16.msra.mxu0 %v3571_v38 }
 0x1b9   :  { %3179 = vmatprep.subr.bf16.mxu0 %v3573_v42  ;;  %v3585_v42 = vld [vmem:[%s4066_s9 + $0x58] sm:$0xff]  }
 0x1bb   :  { %2156 = vmatpush1.bf16.msra.mxu1 %v3541_v12 }
 0x1bc   :  { %2157 = vmatprep.subr.bf16.mxu1 %v3546_v48  ;;  %3180 = vmatpush3.bf16.msra.mxu0 %v3574_v45  ;;  %v3557_v48 = vld [vmem:[%s4066_s9 + $0x80] sm:$0xff]  }
 0x1bd   :  { %3181 = vmatprep.subr.bf16.mxu0 %v3576_v54  ;;  %v3587_v45 = vld [vmem:[%s4066_s9 + $0x60] sm:$0xff]   ;;  %v3592_v54 = vld [vmem:[%s4066_s9 + $0x30] sm:$0xff]  }
 0x1bf   :  { %2158 = vmatpush1.bf16.msra.mxu1 %v3544_v13 }
 0x1c0   :  { %3229 = vmatprep.subr.bf16.mxu1 %v3649_v15  ;;  %3182 = vmatpush3.bf16.msra.mxu0 %v3577_v55 }
 0x1c1   :  { %3198 = vmatprep.subr.bf16.mxu0 %v3579_v56  ;;  %v3593_v56 = vld [vmem:[%s4066_s9 + $0x78] sm:$0xff]  }
 0x1c2   :  { %2160 = vmatmul.mubr.bf16.vlgmr.msra.gmra.mrb[24].mxu1 %v602_v1 }
 0x1c3   :  { %3230 = vmatpush3.bf16.msra.mxu1 %v3547_v14  ;;  %3245 = vmatprep.mubr.msk.bf16.mxu1 %vm3650_vm4, %v3649_v15  ;;  %v3560_v14 = vld [vmem:[%s4066_s9 + $0x88] sm:$0xff]  }
 0x1c4   :  { %3231 = vmatprep.subr.bf16.mxu1 %v3649_v15 }
 0x1c7   :  { %3232 = vmatpush3.bf16.msra.mxu1 %v3548_v3  ;;  %v3566_v3 = vld [vmem:[%s4066_s9 + $0x98] sm:$0xff]  }
 0x1c8   :  { %3233 = vmatprep.subr.bf16.mxu1 %v3649_v15 }
 0x1cb   :  { %3234 = vmatpush3.bf16.msra.mxu1 %v3549_v16  ;;  %v3569_v16 = vld [vmem:[%s4066_s9 + $0xa0] sm:$0xff]  }
 0x1cc   :  { %3235 = vmatprep.subr.bf16.mxu1 %v3649_v15 }
 0x1cf   :  { %3236 = vmatpush3.bf16.msra.mxu1 %v3550_v17  ;;  %v741_v17 = vrot.slane %v3932_v36, %v3820_v49 }
 0x1d0   :  { %3237 = vmatprep.subr.bf16.mxu1 %v3649_v15 }
 0x1d3   :  { %3238 = vmatpush3.bf16.msra.mxu1 %v3551_v18  ;;  %v3572_v18 = vld [vmem:[%s4066_s9 + $0xa8] sm:$0xff]  }
 0x1d4   :  { %3239 = vmatprep.subr.bf16.mxu1 %v3649_v15 }
 0x1d7   :  { %3240 = vmatpush3.bf16.msra.mxu1 %v3552_v19  ;;  %v1562_v19 = vrot.slane %v1557_v5, %v3812_v46 }
 0x1d8   :  { %3241 = vmatprep.subr.bf16.mxu1 %v3649_v15 }
 0x1db   :  { %3242 = vmatpush3.bf16.msra.mxu1 %v3553_v22 }
 0x1dc   :  { %3243 = vmatprep.subr.bf16.mxu1 %v3649_v15 }
 0x1df   :  { %3244 = vmatpush3.bf16.msra.mxu1 %v3554_v26 }
 0x1e0   :  { %3249 = vmatprep.subr.bf16.mxu1 %v3649_v15 }
 0x1f5   :  { %v3095_v20 = vpop.f32.mrb[16].mxu1 }
 0x1f6   :  { %v3096_v21 = vpop.f32.mrb[17].mxu1 }
 0x1f7   :  { %v3097_v23 = vadd.f32 %v3096_v21, %v3095_v20  ;;  %v3098_v24 = vpop.f32.mrb[18].mxu1  ;;  %v1566_v20 = vrot.slane %v1557_v5, %v3820_v49  ;;  %v3578_v49 = vld [vmem:[%s4066_s9 + $0xb8] sm:$0xff]  }
 0x1f8   :  { %v3099_v25 = vpop.f32.mrb[19].mxu1 }
 0x1f9   :  { %v1378_v47 = vadd.f32 %v3097_v23, %v745_v39  ;;  %v3575_v23 = vld [vmem:[%s4066_s9 + $0xb0] sm:$0xff]  }
 0x1fa   :  { %v3583_v39 = vld [vmem:[%s4066_s9 + $0x50] sm:$0xff]  }
 0x215   :  { %v3117_v40 = vpop.f32.mrb[20].mxu1 }
 0x216   :  { %v3118_v44 = vpop.f32.mrb[21].mxu1 }
 0x217   :  { %v3119_v51 = vadd.f32 %v3118_v44, %v3117_v40  ;;  %v3120_v52 = vpop.f32.mrb[22].mxu1  ;;  %v3584_v40 = vld [vmem:[%s4066_s9 + $0x10] sm:$0xff]   ;;  %v3586_v44 = vld [vmem:[%s4066_s9 + $0x18] sm:$0xff]  }
 0x218   :  { %v3121_v50 = vpop.f32.mrb[23].mxu1  ;;  %v3590_v52 = vld [vmem:[%s4066_s9 + $0x28] sm:$0xff]  }
 0x219   :  { %v3948_v53 = vadd.f32 %v3119_v51, %v1378_v47  ;;  %v3588_v47 = vld [vmem:[%s4066_s9 + $0x20] sm:$0xff]   ;;  %v3589_v51 = vld [vmem:[%s4066_s9 + $0x68] sm:$0xff]   ;;  %v737_v50 = vrot.slane %v3932_v36, %v3812_v46  ;;  %v3594_v46 = vld [vmem:[%s4066_s9 + $0x38] sm:$0xff]  }
 0x21b   :  { %v1425_v32 = vmax.f32 %v3948_v53, 0.0  ;;  %v3591_v53 = vld [vmem:[%s4066_s9 + $0x70] sm:$0xff]  }
 0x21d   :  { %v1428_v38 = vpack.c.bf16 %v1425_v32, %v1425_v32 }
 0x235   :  { %v3959_v58 = vpop.f32.mrb[16].mxu0 }
 0x236   :  { %v1338_v59 = vpop.f32.mrb[17].mxu0  ;;  %v3269_v55 = vadd.f32 %v3959_v58, %v737_v50 }
 0x237   :  { %v1340_v60 = vpop.f32.mrb[18].mxu0  ;;  %v3270_v21 = vadd.f32 %v1338_v59, %v741_v17 }
 0x238   :  { %v1341_v61 = vpop.f32.mrb[19].mxu0  ;;  %v1423_v36 = vmax.f32 %v3269_v55, 0.0 }
 0x239   :  { %v1424_v28 = vmax.f32 %v3270_v21, 0.0 }
 0x23a   :  { %v1426_v59 = vpack.c.bf16 %v1423_v36, %v1423_v36 }
 0x23b   :  { %v1427_v37 = vpack.c.bf16 %v1424_v28, %v1424_v28 }
 0x255   :  { %v3139_v62 = vpop.f32.mrb[20].mxu0 }
 0x256   :  { %v3140_v63 = vpop.f32.mrb[21].mxu0 }
 0x257   :  { %v3141_v0 = vadd.f32 %v3140_v63, %v3139_v62  ;;  %v3142_v1 = vpop.f32.mrb[22].mxu0 }
 0x258   :  { %v3143_v2 = vpop.f32.mrb[23].mxu0 }
 0x259   :  { %v2203_v41 = vadd.f32 %v3141_v0, %v1570_v6 }
 0x276   :  { %v3161_v7 = vpop.f32.mrb[24].mxu0 }
 0x277   :  { %v3162_v4 = vpop.f32.mrb[25].mxu0 }
 0x278   :  { %v3163_v8 = vadd.f32 %v3162_v4, %v3161_v7  ;;  %v3164_v9 = vpop.f32.mrb[26].mxu0 }
 0x279   :  { %v3165_v10 = vpop.f32.mrb[27].mxu0 }
 0x27a   :  { %v2243_v11 = vadd.f32 %v3163_v8, %v2203_v41 }
 0x27c   :  { %v2250_v12 = vmax.f32 %v2243_v11, 0.0 }
 0x27e   :  { %v2253_v13 = vpack.c.bf16 %v2250_v12, %v2250_v12 }
 0x280   :  { %3246 = vmatmul.mubr.bf16.vlgmr.msra.gmra.mrb[28].mxu1 %v2253_v13 }
 0x281   :  { %3250 = vmatpush3.bf16.msra.mxu1 %v3557_v48  ;;  %3265 = vmatprep.mubr.msk.bf16.mxu1 %vm3650_vm4, %v3649_v15 }
 0x282   :  { %3251 = vmatprep.subr.bf16.mxu1 %v3649_v15 }
 0x285   :  { %3252 = vmatpush3.bf16.msra.mxu1 %v3560_v14  ;;  %v3078_v14 = vld [vmem:[%s4068_s11] ss:$0 sm:$0xff] }
 0x286   :  { %3253 = vmatprep.subr.bf16.mxu1 %v3649_v15 }
 0x289   :  { %3254 = vmatpush3.bf16.msra.mxu1 %v3563_v57 }
 0x28a   :  { %3255 = vmatprep.subr.bf16.mxu1 %v3649_v15 }
 0x28d   :  { %3256 = vmatpush3.bf16.msra.mxu1 %v3566_v3 }
 0x28e   :  { %3257 = vmatprep.subr.bf16.mxu1 %v3649_v15 }
 0x291   :  { %3258 = vmatpush3.bf16.msra.mxu1 %v3569_v16 }
 0x292   :  { %3259 = vmatprep.subr.bf16.mxu1 %v3649_v15 }
 0x295   :  { %3260 = vmatpush3.bf16.msra.mxu1 %v3572_v18  ;;  %v2161_v22 = vpop.f32.mrb[24].mxu1 }
 0x296   :  { %v3271_v24 = vadd.f32 %v2161_v22, %v1562_v19  ;;  %v2163_v25 = vpop.f32.mrb[25].mxu1  ;;  %3261 = vmatprep.subr.bf16.mxu1 %v3649_v15 }
 0x297   :  { %v3272_v26 = vadd.f32 %v2163_v25, %v1566_v20  ;;  %v2165_v27 = vpop.f32.mrb[26].mxu1 }
 0x298   :  { %v2248_v29 = vmax.f32 %v3271_v24, 0.0  ;;  %v2166_v30 = vpop.f32.mrb[27].mxu1 }
 0x299   :  { %v2249_v31 = vmax.f32 %v3272_v26, 0.0  ;;  %3262 = vmatpush3.bf16.msra.mxu1 %v3575_v23 }
 0x29a   :  { %3263 = vmatprep.subr.bf16.mxu1 %v3649_v15  ;;  %v2251_v34 = vpack.c.bf16 %v2248_v29, %v2248_v29  ;;  %v3582_v15 = vld [vmem:[%s4066_s9 + $0x8] sm:$0xff]  }
 0x29b   :  { %v2252_v43 = vpack.c.bf16 %v2249_v31, %v2249_v31 }
 0x29d   :  { %3264 = vmatpush3.bf16.msra.mxu1 %v3578_v49  ;;  %2526 = vmatprep.mubr.bf16.mxu0 %v2252_v43 }
 0x29e   :  { %2527 = vmatmul.mubr.bf16.vlgmr.msra.gmra.mrb[28].mxu0 %v2251_v34 }
 0x29f   :  { %3199 = vmatpush3.bf16.msra.mxu0 %v3580_v33  ;;  %2750 = vmatprep.mubr.bf16.mxu0 %v1427_v37 }
 0x2a0   :  { %3266 = vmatmul.mubr.bf16.vlgmr.msra.gmra.mrb[32].mxu1 %v1428_v38  ;;  %3200 = vmatprep.subr.bf16.mxu0 %v3581_v35 }
 0x2a3   :  { %3201 = vmatpush3.bf16.msra.mxu0 %v3582_v15 }
 0x2a4   :  { %3202 = vmatprep.subr.bf16.mxu0 %v3583_v39 }
 0x2a7   :  { %3203 = vmatpush3.bf16.msra.mxu0 %v3584_v40 }
 0x2a8   :  { %3204 = vmatprep.subr.bf16.mxu0 %v3585_v42 }
 0x2ab   :  { %3205 = vmatpush3.bf16.msra.mxu0 %v3586_v44 }
 0x2ac   :  { %3206 = vmatprep.subr.bf16.mxu0 %v3587_v45 }
 0x2af   :  { %3207 = vmatpush3.bf16.msra.mxu0 %v3588_v47 }
 0x2b0   :  { %3208 = vmatprep.subr.bf16.mxu0 %v3589_v51 }
 0x2b3   :  { %3209 = vmatpush3.bf16.msra.mxu0 %v3590_v52 }
 0x2b4   :  { %3210 = vmatprep.subr.bf16.mxu0 %v3591_v53 }
 0x2b7   :  { %3211 = vmatpush3.bf16.msra.mxu0 %v3592_v54 }
 0x2b8   :  { %3212 = vmatprep.subr.bf16.mxu0 %v3593_v56 }
 0x2bb   :  { %3213 = vmatpush3.bf16.msra.mxu0 %v3594_v46 }
 0x2be   :  { %2751 = vmatmul.mubr.bf16.vlgmr.msra.gmra.mrb[32].mxu0 %v1426_v59 }
 0x353   :  { %v2568_v60 = vpop.f32.mrb[28].mxu1 }
 0x354   :  { %v3247_v61 = vpop.f32.mrb[29].mxu1 }
 0x355   :  { %v2571_v62 = vpop.f32.mrb[30].mxu1 }
 0x356   :  { %v3248_v63 = vpop.f32.mrb[31].mxu1 }
 0x371   :  { %v3183_v58 = vpop.f32.mrb[28].mxu0 }
 0x372   :  { %v3184_v0 = vpop.f32.mrb[29].mxu0 }
 0x373   :  { %v2792_v1 = vpop.f32.mrb[32].mxu1  ;;  %v3185_v2 = vadd.f32 %v3184_v0, %v3183_v58  ;;  %v3186_v5 = vpop.f32.mrb[30].mxu0 }
 0x374   :  { %v3267_v6 = vpop.f32.mrb[33].mxu1  ;;  %v3187_v7 = vpop.f32.mrb[31].mxu0 }
 0x375   :  { %v2569_v4 = vadd.f32 %v3185_v2, %v2568_v60  ;;  %v2795_v41 = vpop.f32.mrb[34].mxu1 }
 0x376   :  { %v3268_v8 = vpop.f32.mrb[35].mxu1 }
 0x391   :  { %v3214_v9 = vpop.f32.mrb[32].mxu0 }
 0x392   :  { %v3215_v10 = vpop.f32.mrb[33].mxu0 }
 0x393   :  { %v3216_v11 = vadd.f32 %v3215_v10, %v3214_v9  ;;  %v3217_v12 = vpop.f32.mrb[34].mxu0 }
 0x394   :  { %v3218_v48 = vpop.f32.mrb[35].mxu0 }
 0x395   :  { %v2753_v13 = vadd.f32 %v3216_v11, %v2569_v4 }
 0x397   :  { %v2793_v57 = vadd.f32 %v2792_v1, %v2753_v13 }
 0x399   :  { %v2805_v3 = vadd.f32 %v3078_v14, %v2793_v57 }
 0x39b   :  { %2807 = vst.msk [vmem:[%s4069_s12] sm:$0xff] %vm2806_vm5, %v2805_v3 }
 0x39c   :  { %2812 = vsyncpa [#allocation3], 1 }
 0x39d   :  { %2813 = vsyncpa [#allocation5], 1 }

</bundles_post_ra>
